<compile_context>
chip_gen: v6e
topology: v6e:2x2x1
jax: 0.10.0
libtpu: 0.0.40
codegen_flags: <defaults>
</compile_context>

<pallas_src>
import jax
import jax.numpy as jnp
from jax import lax
from jax.experimental import pallas as pl
from jax.experimental.pallas import tpu as pltpu

EPS = 1e-5
LANE = 128
VMEM_LIMIT = 32 * 1024 * 1024   # safe on v5e/v6e/v7x; tiles below are << this


# ---------------------------------------------------------------------------
# small helpers
# ---------------------------------------------------------------------------
def _round_up(x, m):
    return (x + m - 1) // m * m


def _pick_tm(m):
    # Largest row tile that amortizes the ~0.35us per-grid-step overhead while
    # keeping double-buffered bf16 tiles far below even v7x's 64 MiB VMEM.
    tm = 512
    while tm > max(m, 16):
        tm //= 2
    return max(tm, 16)


def _pad2(a, rows, cols):
    r, c = a.shape
    return jnp.pad(a, ((0, rows - r), (0, cols - c)))


def _params_1d():
    return pltpu.CompilerParams(dimension_semantics=("parallel",),
                                vmem_limit_bytes=VMEM_LIMIT)


# ---------------------------------------------------------------------------
# Kernels
# ---------------------------------------------------------------------------
def matmul_stats_kernel(p_ref, w_ref, y_ref, sum_ref, sq_ref):
    # conv tile = patches @ weights (bf16 in, f32 MXU accumulate)
    # + per-tile per-channel BN partials (sum, sum of squares).
    y = jnp.dot(p_ref[...], w_ref[...], preferred_element_type=jnp.float32)
    y_ref[...] = y
    sum_ref[...] = jnp.sum(y, axis=0, keepdims=True)[None]
    sq_ref[...] = jnp.sum(y * y, axis=0, keepdims=True)[None]


def dual_matmul_stats_kernel(p_ref, w_ref, ps_ref, ws_ref,
                             y_ref, s_ref, ysum_ref, ysq_ref,
                             ssum_ref, ssq_ref):
    # Main 3x3 conv tile and 1x1 projection-shortcut tile in one grid step.
    y = jnp.dot(p_ref[...], w_ref[...], preferred_element_type=jnp.float32)
    y_ref[...] = y
    ysum_ref[...] = jnp.sum(y, axis=0, keepdims=True)[None]
    ysq_ref[...] = jnp.sum(y * y, axis=0, keepdims=True)[None]
    s = jnp.dot(ps_ref[...], ws_ref[...], preferred_element_type=jnp.float32)
    s_ref[...] = s
    ssum_ref[...] = jnp.sum(s, axis=0, keepdims=True)[None]
    ssq_ref[...] = jnp.sum(s * s, axis=0, keepdims=True)[None]


def bn_relu_kernel(y_ref, scale_ref, shift_ref, o_ref):
    # out = relu(y * scale + shift), per-channel scale/shift precomputed.
    o_ref[...] = jnp.maximum(y_ref[...] * scale_ref[...] + shift_ref[...],
                             0.0).astype(o_ref.dtype)


def bn_add_relu_kernel(y_ref, s_ref, sc2_ref, sh2_ref, scs_ref, shs_ref, o_ref):
    # out = relu(bn2(y) + bn_s(s))   (identity shortcut uses scale=1, shift=0)
    y = y_ref[...] * sc2_ref[...] + sh2_ref[...]
    s = s_ref[...] * scs_ref[...] + shs_ref[...]
    o_ref[...] = jnp.maximum(y + s, 0.0).astype(o_ref.dtype)


# ---------------------------------------------------------------------------
# pallas_call wrappers
# ---------------------------------------------------------------------------
def _finish_stats(ssum, ssq, true_m):
    # Combine per-tile partials -> batch mean / biased variance (PyTorch BN).
    mean = jnp.sum(ssum, axis=0) / true_m                       # (1, cp)
    var = jnp.maximum(jnp.sum(ssq, axis=0) / true_m - mean * mean, 0.0)
    return mean, var


def _conv_matmul_stats(p, w, true_m, tm):
    mp, kp = p.shape
    cp = w.shape[1]
    nt = mp // tm
    cost = pl.CostEstimate(
        flops=int(2 * mp * kp * cp), transcendentals=0,
        bytes_accessed=int(2 * (p.size + w.size) + 4 * mp * cp))
    y, ssum, ssq = pl.pallas_call(
        matmul_stats_kernel,
        out_shape=(jax.ShapeDtypeStruct((mp, cp), jnp.float32),
                   jax.ShapeDtypeStruct((nt, 1, cp), jnp.float32),
                   jax.ShapeDtypeStruct((nt, 1, cp), jnp.float32)),
        grid_spec=pltpu.PrefetchScalarGridSpec(
            num_scalar_prefetch=0, grid=(nt,),
            in_specs=[pl.BlockSpec((tm, kp), lambda i: (i, 0)),
                      pl.BlockSpec((kp, cp), lambda i: (0, 0))],   # resident
            out_specs=[pl.BlockSpec((tm, cp), lambda i: (i, 0)),
                       pl.BlockSpec((1, 1, cp), lambda i: (i, 0, 0)),
                       pl.BlockSpec((1, 1, cp), lambda i: (i, 0, 0))]),
        compiler_params=_params_1d(),
        cost_estimate=cost,
    )(p, w)
    return y, _finish_stats(ssum, ssq, true_m)


def _dual_conv_matmul_stats(p, w, ps, ws, true_m, tm):
    mp, kp = p.shape
    kps = ps.shape[1]
    cp = w.shape[1]
    nt = mp // tm
    cost = pl.CostEstimate(
        flops=int(2 * mp * (kp + kps) * cp), transcendentals=0,
        bytes_accessed=int(2 * (p.size + w.size + ps.size + ws.size)
                           + 8 * mp * cp))
    tile_p = pl.BlockSpec((tm, kp), lambda i: (i, 0))
    tile_ps = pl.BlockSpec((tm, kps), lambda i: (i, 0))
    res_w = pl.BlockSpec((kp, cp), lambda i: (0, 0))
    res_ws = pl.BlockSpec((kps, cp), lambda i: (0, 0))
    tile_o = pl.BlockSpec((tm, cp), lambda i: (i, 0))
    st = pl.BlockSpec((1, 1, cp), lambda i: (i, 0, 0))
    y, s, ysum, ysq, ssum, ssq = pl.pallas_call(
        dual_matmul_stats_kernel,
        out_shape=(jax.ShapeDtypeStruct((mp, cp), jnp.float32),
                   jax.ShapeDtypeStruct((mp, cp), jnp.float32),
                   jax.ShapeDtypeStruct((nt, 1, cp), jnp.float32),
                   jax.ShapeDtypeStruct((nt, 1, cp), jnp.float32),
                   jax.ShapeDtypeStruct((nt, 1, cp), jnp.float32),
                   jax.ShapeDtypeStruct((nt, 1, cp), jnp.float32)),
        grid_spec=pltpu.PrefetchScalarGridSpec(
            num_scalar_prefetch=0, grid=(nt,),
            in_specs=[tile_p, res_w, tile_ps, res_ws],
            out_specs=[tile_o, tile_o, st, st, st, st]),
        compiler_params=_params_1d(),
        cost_estimate=cost,
    )(p, w, ps, ws)
    return y, s, _finish_stats(ysum, ysq, true_m), _finish_stats(ssum, ssq, true_m)


def _bn_relu_apply(y, scale, shift, tm, out_dtype):
    mp, cp = y.shape
    nt = mp // tm
    return pl.pallas_call(
        bn_relu_kernel,
        out_shape=jax.ShapeDtypeStruct((mp, cp), out_dtype),
        grid_spec=pltpu.PrefetchScalarGridSpec(
            num_scalar_prefetch=0, grid=(nt,),
            in_specs=[pl.BlockSpec((tm, cp), lambda i: (i, 0)),
                      pl.BlockSpec((1, cp), lambda i: (0, 0)),
                      pl.BlockSpec((1, cp), lambda i: (0, 0))],
            out_specs=pl.BlockSpec((tm, cp), lambda i: (i, 0))),
        compiler_params=_params_1d(),
        cost_estimate=pl.CostEstimate(flops=int(2 * mp * cp), transcendentals=0,
                                      bytes_accessed=int(8 * mp * cp)),
    )(y, scale, shift)


def _bn_add_relu_apply(y, s, sc2, sh2, scs, shs, tm):
    mp, cp = y.shape
    nt = mp // tm
    tile = pl.BlockSpec((tm, cp), lambda i: (i, 0))
    vec = pl.BlockSpec((1, cp), lambda i: (0, 0))
    return pl.pallas_call(
        bn_add_relu_kernel,
        out_shape=jax.ShapeDtypeStruct((mp, cp), jnp.float32),
        grid_spec=pltpu.PrefetchScalarGridSpec(
            num_scalar_prefetch=0, grid=(nt,),
            in_specs=[tile, tile, vec, vec, vec, vec],
            out_specs=tile),
        compiler_params=_params_1d(),
        cost_estimate=pl.CostEstimate(flops=int(5 * mp * cp), transcendentals=0,
                                      bytes_accessed=int(12 * mp * cp)),
    )(y, s, sc2, sh2, scs, shs)


# ---------------------------------------------------------------------------
# Plain-JAX glue: layout / im2col / weight reshape / BN scale-shift
# ---------------------------------------------------------------------------
def _im2col(x_nhwc, ksize, stride, pad):
    n, h, w, c = x_nhwc.shape
    xp = jnp.pad(x_nhwc, ((0, 0), (pad, pad), (pad, pad), (0, 0)))
    ho = (h + 2 * pad - ksize) // stride + 1
    wo = (w + 2 * pad - ksize) // stride + 1
    taps = []
    for dh in range(ksize):
        for dw in range(ksize):
            taps.append(xp[:, dh:dh + stride * ho:stride,
                           dw:dw + stride * wo:stride, :])
    patches = jnp.stack(taps, axis=3)               # (n, ho, wo, k*k, c)
    return patches.reshape(n * ho * wo, ksize * ksize * c), (n, ho, wo)


def _conv_w_to_mat(w):
    # PyTorch conv weight (Cout, Cin, kh, kw) -> matmul weight (kh*kw*Cin, Cout)
    co, ci, kh, kw = w.shape
    return jnp.transpose(w, (2, 3, 1, 0)).reshape(kh * kw * ci, co)


def _bn_scale_shift(mean, var, gamma, beta):
    scale = gamma * lax.rsqrt(var + EPS)            # per-channel, tiny
    return scale, beta - mean * scale


# ---------------------------------------------------------------------------
# BasicBlock forward
# ---------------------------------------------------------------------------
def basic_block_forward(x_nchw, params, stride):
    x = jnp.transpose(x_nchw, (0, 2, 3, 1)).astype(jnp.float32)   # NCHW -> NHWC
    _, _, _, cin = x.shape
    planes = params["conv1_w"].shape[0]
    cp = _round_up(planes, LANE)                    # lane-dense channel pad

    # ---- conv1 (3x3, stride, pad=1) + bn1 + relu --------------------------
    p1, (n, ho, wo) = _im2col(x, 3, stride, 1)
    m = n * ho * wo
    tm = _pick_tm(m)
    mp = _round_up(m, tm)
    kp1 = _round_up(p1.shape[1], LANE)
    p1 = _pad2(p1, mp, kp1).astype(jnp.bfloat16)
    w1 = _pad2(_conv_w_to_mat(params["conv1_w"]), kp1, cp).astype(jnp.bfloat16)
    y1_raw, (mean1, var1) = _conv_matmul_stats(p1, w1, m, tm)
    sc1, sh1 = _bn_scale_shift(mean1, var1,
                               _pad2(params["bn1_gamma"], 1, cp),
                               _pad2(params["bn1_beta"], 1, cp))
    y1 = _bn_relu_apply(y1_raw, sc1, sh1, tm, jnp.bfloat16)       # (mp, cp) bf16

    # ---- conv2 (3x3, s=1, pad=1) [+ 1x1 projection] + bn + add + relu -----
    y1_nhwc = y1[:m, :planes].reshape(n, ho, wo, planes)
    p2, _ = _im2col(y1_nhwc, 3, 1, 1)
    kp2 = _round_up(p2.shape[1], LANE)
    p2 = _pad2(p2, mp, kp2)                                       # bf16 already
    w2 = _pad2(_conv_w_to_mat(params["conv2_w"]), kp2, cp).astype(jnp.bfloat16)
    g2 = _pad2(params["bn2_gamma"], 1, cp)
    b2 = _pad2(params["bn2_beta"], 1, cp)

    if stride != 1 or cin != planes:
        # projection shortcut: 1x1 conv fused into the same grid pass as conv2
        xs = x[:, ::stride, ::stride, :].reshape(m, cin)
        kps = _round_up(cin, LANE)
        xs = _pad2(xs, mp, kps).astype(jnp.bfloat16)
        ws = _pad2(_conv_w_to_mat(params["sc_w"]), kps, cp).astype(jnp.bfloat16)
        y2_raw, s_raw, (mean2, var2), (means, vars_) = _dual_conv_matmul_stats(
            p2, w2, xs, ws, m, tm)
        scs, shs = _bn_scale_shift(means, vars_,
                                   _pad2(params["sc_bn_gamma"], 1, cp),
                                   _pad2(params["sc_bn_beta"], 1, cp))
    else:
        # identity shortcut: add x directly (scale=1, shift=0 in final kernel)
        y2_raw, (mean2, var2) = _conv_matmul_stats(p2, w2, m, tm)
        s_raw = _pad2(x.reshape(m, cin), mp, cp)                  # f32
        scs = jnp.ones((1, cp), jnp.float32)
        shs = jnp.zeros((1, cp), jnp.float32)

    sc2, sh2 = _bn_scale_shift(mean2, var2, g2, b2)
    out = _bn_add_relu_apply(y2_raw, s_raw, sc2, sh2, scs, shs, tm)
    out = out[:m, :planes].reshape(n, ho, wo, planes)
    return jnp.transpose(out, (0, 3, 1, 2))                       # -> NCHW


# ---------------------------------------------------------------------------
# Deterministic parameter init (shapes from BasicBlock.__init__)
# ---------------------------------------------------------------------------
def init_params(key, in_planes, planes, stride):
    k1, k2, k3 = jax.random.split(key, 3)

    def conv_w(k, shape):  # uniform(-1/sqrt(fan_in), +1/sqrt(fan_in)), no bias
        fan_in = shape[1] * shape[2] * shape[3]
        bound = (1.0 / fan_in) ** 0.5
        return jax.random.uniform(k, shape, jnp.float32, -bound, bound)

    params = {
        "conv1_w": conv_w(k1, (planes, in_planes, 3, 3)),
        "bn1_gamma": jnp.ones((1, planes), jnp.float32),
        "bn1_beta": jnp.zeros((1, planes), jnp.float32),
        "conv2_w": conv_w(k2, (planes, planes, 3, 3)),
        "bn2_gamma": jnp.ones((1, planes), jnp.float32),
        "bn2_beta": jnp.zeros((1, planes), jnp.float32),
    }
    if stride != 1 or in_planes != planes:
        params["sc_w"] = conv_w(k3, (planes, in_planes, 1, 1))
        params["sc_bn_gamma"] = jnp.ones((1, planes), jnp.float32)
        params["sc_bn_beta"] = jnp.zeros((1, planes), jnp.float32)
    return params


if __name__ == "__main__":
    fwd = jax.jit(basic_block_forward, static_argnums=2)
    key = jax.random.PRNGKey(0)
    kx1, kp1, kx2, kp2 = jax.random.split(key, 4)

    # Projection-shortcut block: in_planes=4 -> planes=8, stride=2
    x1 = jax.random.normal(kx1, (2, 4, 16, 16), jnp.float32)      # NCHW
    params1 = init_params(kp1, 4, 8, 2)
    out1 = jax.block_until_ready(fwd(x1, params1, 2))
    assert out1.shape == (2, 8, 8, 8), out1.shape
    assert bool(jnp.all(jnp.isfinite(out1))) and bool(jnp.all(out1 >= 0.0))

    # Identity-shortcut block: in_planes = planes = 8, stride=1
    x2 = jax.random.normal(kx2, (2, 8, 8, 8), jnp.float32)
    params2 = init_params(kp2, 8, 8, 1)
    out2 = jax.block_until_ready(fwd(x2, params2, 1))
    assert out2.shape == (2, 8, 8, 8), out2.shape
    assert bool(jnp.all(jnp.isfinite(out2))) and bool(jnp.all(out2 >= 0.0))

    print("KERNEL_OK")
</pallas_src>

<mosaic_0001>
module attributes {stable_mosaic.version = 11 : i64} {
  func.func @matmul_stats_kernel(%arg0: i32, %arg1: memref<128x128xbf16, #tpu.memory_space<vmem>>, %arg2: memref<128x128xbf16, #tpu.memory_space<vmem>>, %arg3: memref<128x128xf32, #tpu.memory_space<vmem>>, %arg4: memref<1x1x128xf32, #tpu.memory_space<vmem>>, %arg5: memref<1x1x128xf32, #tpu.memory_space<vmem>>) attributes {dimension_semantics = [#tpu.dimension_semantics<parallel>], iteration_bounds = array<i64: 1>, scalar_prefetch = 0 : i64, scratch_operands = 0 : i64, tpu.core_type = #tpu.core_type<tc>, window_params = [{transform_indices = @transform_0, window_bounds = array<i64: 128, 128>}, {pipeline_mode = #tpu.pipeline_mode<synchronous>, transform_indices = @transform_1, window_bounds = array<i64: 128, 128>}, {transform_indices = @transform_2, window_bounds = array<i64: 128, 128>}, {transform_indices = @transform_3, window_bounds = array<i64: 1, 1, 128>}, {transform_indices = @transform_4, window_bounds = array<i64: 1, 1, 128>}]} {
    %c0 = arith.constant 0 : index
    %c0_0 = arith.constant 0 : index
    %0 = vector.load %arg1[%c0, %c0_0] : memref<128x128xbf16, #tpu.memory_space<vmem>>, vector<128x128xbf16>
    %c0_1 = arith.constant 0 : index
    %c0_2 = arith.constant 0 : index
    %1 = vector.load %arg2[%c0_1, %c0_2] : memref<128x128xbf16, #tpu.memory_space<vmem>>, vector<128x128xbf16>
    %cst = arith.constant dense<0.000000e+00> : vector<128x128xf32>
    %2 = tpu.matmul %0, %1, %cst {dimension_numbers = #tpu.dot_dimension_numbers<[1], [0], [0], [1], [0, 0, 1, 1], [], []>} : vector<128x128xbf16>, vector<128x128xbf16>, vector<128x128xf32> -> vector<128x128xf32>
    %c0_3 = arith.constant 0 : index
    %c0_4 = arith.constant 0 : index
    %3 = vector.load %arg3[%c0_3, %c0_4] : memref<128x128xf32, #tpu.memory_space<vmem>>, vector<128x128xf32>
    tpu.vector_store %arg3[%c0_3, %c0_4], %2 {strides = array<i32>} : memref<128x128xf32, #tpu.memory_space<vmem>>, vector<128x128xf32>,
    %cst_5 = arith.constant dense<0.000000e+00> : vector<128xf32>
    %4 = vector.multi_reduction <add>, %2, %cst_5 [0] : vector<128x128xf32> to vector<128xf32>
    %5 = vector.shape_cast %4 : vector<128xf32> to vector<1x128xf32>
    %6 = vector.shape_cast %5 : vector<1x128xf32> to vector<1x1x128xf32>
    %c0_6 = arith.constant 0 : index
    %c0_7 = arith.constant 0 : index
    %c0_8 = arith.constant 0 : index
    %7 = vector.load %arg4[%c0_6, %c0_7, %c0_8] : memref<1x1x128xf32, #tpu.memory_space<vmem>>, vector<1x1x128xf32>
    tpu.vector_store %arg4[%c0_6, %c0_7, %c0_8], %6 {strides = array<i32>} : memref<1x1x128xf32, #tpu.memory_space<vmem>>, vector<1x1x128xf32>,
    %8 = arith.mulf %2, %2 : vector<128x128xf32>
    %cst_9 = arith.constant dense<0.000000e+00> : vector<128xf32>
    %9 = vector.multi_reduction <add>, %8, %cst_9 [0] : vector<128x128xf32> to vector<128xf32>
    %10 = vector.shape_cast %9 : vector<128xf32> to vector<1x128xf32>
    %11 = vector.shape_cast %10 : vector<1x128xf32> to vector<1x1x128xf32>
    %c0_10 = arith.constant 0 : index
    %c0_11 = arith.constant 0 : index
    %c0_12 = arith.constant 0 : index
    %12 = vector.load %arg5[%c0_10, %c0_11, %c0_12] : memref<1x1x128xf32, #tpu.memory_space<vmem>>, vector<1x1x128xf32>
    tpu.vector_store %arg5[%c0_10, %c0_11, %c0_12], %11 {strides = array<i32>} : memref<1x1x128xf32, #tpu.memory_space<vmem>>, vector<1x1x128xf32>,
    return
  }
  func.func @transform_0(%arg0: i32) -> (i32, i32) {
    %c0_i32 = arith.constant 0 : i32
    %c0_i32_0 = arith.constant 0 : i32
    return %arg0, %c0_i32 : i32, i32
  }
  func.func @transform_1(%arg0: i32) -> (i32, i32) {
    %c0_i32 = arith.constant 0 : i32
    %c0_i32_0 = arith.constant 0 : i32
    %c0_i32_1 = arith.constant 0 : i32
    return %c0_i32, %c0_i32_0 : i32, i32
  }
  func.func @transform_2(%arg0: i32) -> (i32, i32) {
    %c0_i32 = arith.constant 0 : i32
    %c0_i32_0 = arith.constant 0 : i32
    return %arg0, %c0_i32 : i32, i32
  }
  func.func @transform_3(%arg0: i32) -> (i32, i32, i32) {
    %c0_i32 = arith.constant 0 : i32
    %c0_i32_0 = arith.constant 0 : i32
    %c0_i32_1 = arith.constant 0 : i32
    return %arg0, %c0_i32, %c0_i32_0 : i32, i32, i32
  }
  func.func @transform_4(%arg0: i32) -> (i32, i32, i32) {
    %c0_i32 = arith.constant 0 : i32
    %c0_i32_0 = arith.constant 0 : i32
    %c0_i32_1 = arith.constant 0 : i32
    return %arg0, %c0_i32, %c0_i32_0 : i32, i32, i32
  }
}

module attributes {stable_mosaic.version = 11 : i64} {
  func.func @bn_relu_kernel(%arg0: i32, %arg1: memref<128x128xf32, #tpu.memory_space<vmem>>, %arg2: memref<1x128xf32, #tpu.memory_space<vmem>>, %arg3: memref<1x128xf32, #tpu.memory_space<vmem>>, %arg4: memref<128x128xbf16, #tpu.memory_space<vmem>>) attributes {dimension_semantics = [#tpu.dimension_semantics<parallel>], iteration_bounds = array<i64: 1>, scalar_prefetch = 0 : i64, scratch_operands = 0 : i64, tpu.core_type = #tpu.core_type<tc>, window_params = [{transform_indices = @transform_0, window_bounds = array<i64: 128, 128>}, {pipeline_mode = #tpu.pipeline_mode<synchronous>, transform_indices = @transform_1, window_bounds = array<i64: 1, 128>}, {pipeline_mode = #tpu.pipeline_mode<synchronous>, transform_indices = @transform_2, window_bounds = array<i64: 1, 128>}, {transform_indices = @transform_3, window_bounds = array<i64: 128, 128>}]} {
    %c0 = arith.constant 0 : index
    %c0_0 = arith.constant 0 : index
    %0 = vector.load %arg1[%c0, %c0_0] : memref<128x128xf32, #tpu.memory_space<vmem>>, vector<128x128xf32>
    %c0_1 = arith.constant 0 : index
    %c0_2 = arith.constant 0 : index
    %1 = vector.load %arg2[%c0_1, %c0_2] : memref<1x128xf32, #tpu.memory_space<vmem>>, vector<1x128xf32>
    %2 = vector.broadcast %1 : vector<1x128xf32> to vector<128x128xf32>
    %3 = arith.mulf %0, %2 : vector<128x128xf32>
    %c0_3 = arith.constant 0 : index
    %c0_4 = arith.constant 0 : index
    %4 = vector.load %arg3[%c0_3, %c0_4] : memref<1x128xf32, #tpu.memory_space<vmem>>, vector<1x128xf32>
    %5 = vector.broadcast %4 : vector<1x128xf32> to vector<128x128xf32>
    %6 = arith.addf %3, %5 : vector<128x128xf32>
    %cst = arith.constant 0.000000e+00 : f32
    %7 = vector.broadcast %cst : f32 to vector<128x128xf32>
    %8 = arith.maximumf %6, %7 : vector<128x128xf32>
    %9 = arith.truncf %8 : vector<128x128xf32> to vector<128x128xbf16>
    %c0_5 = arith.constant 0 : index
    %c0_6 = arith.constant 0 : index
    %10 = vector.load %arg4[%c0_5, %c0_6] : memref<128x128xbf16, #tpu.memory_space<vmem>>, vector<128x128xbf16>
    tpu.vector_store %arg4[%c0_5, %c0_6], %9 {strides = array<i32>} : memref<128x128xbf16, #tpu.memory_space<vmem>>, vector<128x128xbf16>,
    return
  }
  func.func @transform_0(%arg0: i32) -> (i32, i32) {
    %c0_i32 = arith.constant 0 : i32
    %c0_i32_0 = arith.constant 0 : i32
    return %arg0, %c0_i32 : i32, i32
  }
  func.func @transform_1(%arg0: i32) -> (i32, i32) {
    %c0_i32 = arith.constant 0 : i32
    %c0_i32_0 = arith.constant 0 : i32
    %c0_i32_1 = arith.constant 0 : i32
    return %c0_i32, %c0_i32_0 : i32, i32
  }
  func.func @transform_2(%arg0: i32) -> (i32, i32) {
    %c0_i32 = arith.constant 0 : i32
    %c0_i32_0 = arith.constant 0 : i32
    %c0_i32_1 = arith.constant 0 : i32
    return %c0_i32, %c0_i32_0 : i32, i32
  }
  func.func @transform_3(%arg0: i32) -> (i32, i32) {
    %c0_i32 = arith.constant 0 : i32
    %c0_i32_0 = arith.constant 0 : i32
    return %arg0, %c0_i32 : i32, i32
  }
}

module attributes {stable_mosaic.version = 11 : i64} {
  func.func @dual_matmul_stats_kernel(%arg0: i32, %arg1: memref<128x128xbf16, #tpu.memory_space<vmem>>, %arg2: memref<128x128xbf16, #tpu.memory_space<vmem>>, %arg3: memref<128x128xbf16, #tpu.memory_space<vmem>>, %arg4: memref<128x128xbf16, #tpu.memory_space<vmem>>, %arg5: memref<128x128xf32, #tpu.memory_space<vmem>>, %arg6: memref<128x128xf32, #tpu.memory_space<vmem>>, %arg7: memref<1x1x128xf32, #tpu.memory_space<vmem>>, %arg8: memref<1x1x128xf32, #tpu.memory_space<vmem>>, %arg9: memref<1x1x128xf32, #tpu.memory_space<vmem>>, %arg10: memref<1x1x128xf32, #tpu.memory_space<vmem>>) attributes {dimension_semantics = [#tpu.dimension_semantics<parallel>], iteration_bounds = array<i64: 1>, scalar_prefetch = 0 : i64, scratch_operands = 0 : i64, tpu.core_type = #tpu.core_type<tc>, window_params = [{transform_indices = @transform_0, window_bounds = array<i64: 128, 128>}, {pipeline_mode = #tpu.pipeline_mode<synchronous>, transform_indices = @transform_1, window_bounds = array<i64: 128, 128>}, {transform_indices = @transform_2, window_bounds = array<i64: 128, 128>}, {pipeline_mode = #tpu.pipeline_mode<synchronous>, transform_indices = @transform_3, window_bounds = array<i64: 128, 128>}, {transform_indices = @transform_4, window_bounds = array<i64: 128, 128>}, {transform_indices = @transform_5, window_bounds = array<i64: 128, 128>}, {transform_indices = @transform_6, window_bounds = array<i64: 1, 1, 128>}, {transform_indices = @transform_7, window_bounds = array<i64: 1, 1, 128>}, {transform_indices = @transform_8, window_bounds = array<i64: 1, 1, 128>}, {transform_indices = @transform_9, window_bounds = array<i64: 1, 1, 128>}]} {
    %c0 = arith.constant 0 : index
    %c0_0 = arith.constant 0 : index
    %0 = vector.load %arg1[%c0, %c0_0] : memref<128x128xbf16, #tpu.memory_space<vmem>>, vector<128x128xbf16>
    %c0_1 = arith.constant 0 : index
    %c0_2 = arith.constant 0 : index
    %1 = vector.load %arg2[%c0_1, %c0_2] : memref<128x128xbf16, #tpu.memory_space<vmem>>, vector<128x128xbf16>
    %cst = arith.constant dense<0.000000e+00> : vector<128x128xf32>
    %2 = tpu.matmul %0, %1, %cst {dimension_numbers = #tpu.dot_dimension_numbers<[1], [0], [0], [1], [0, 0, 1, 1], [], []>} : vector<128x128xbf16>, vector<128x128xbf16>, vector<128x128xf32> -> vector<128x128xf32>
    %c0_3 = arith.constant 0 : index
    %c0_4 = arith.constant 0 : index
    %3 = vector.load %arg5[%c0_3, %c0_4] : memref<128x128xf32, #tpu.memory_space<vmem>>, vector<128x128xf32>
    tpu.vector_store %arg5[%c0_3, %c0_4], %2 {strides = array<i32>} : memref<128x128xf32, #tpu.memory_space<vmem>>, vector<128x128xf32>,
    %cst_5 = arith.constant dense<0.000000e+00> : vector<128xf32>
    %4 = vector.multi_reduction <add>, %2, %cst_5 [0] : vector<128x128xf32> to vector<128xf32>
    %5 = vector.shape_cast %4 : vector<128xf32> to vector<1x128xf32>
    %6 = vector.shape_cast %5 : vector<1x128xf32> to vector<1x1x128xf32>
    %c0_6 = arith.constant 0 : index
    %c0_7 = arith.constant 0 : index
    %c0_8 = arith.constant 0 : index
    %7 = vector.load %arg7[%c0_6, %c0_7, %c0_8] : memref<1x1x128xf32, #tpu.memory_space<vmem>>, vector<1x1x128xf32>
    tpu.vector_store %arg7[%c0_6, %c0_7, %c0_8], %6 {strides = array<i32>} : memref<1x1x128xf32, #tpu.memory_space<vmem>>, vector<1x1x128xf32>,
    %8 = arith.mulf %2, %2 : vector<128x128xf32>
    %cst_9 = arith.constant dense<0.000000e+00> : vector<128xf32>
    %9 = vector.multi_reduction <add>, %8, %cst_9 [0] : vector<128x128xf32> to vector<128xf32>
    %10 = vector.shape_cast %9 : vector<128xf32> to vector<1x128xf32>
    %11 = vector.shape_cast %10 : vector<1x128xf32> to vector<1x1x128xf32>
    %c0_10 = arith.constant 0 : index
    %c0_11 = arith.constant 0 : index
    %c0_12 = arith.constant 0 : index
    %12 = vector.load %arg8[%c0_10, %c0_11, %c0_12] : memref<1x1x128xf32, #tpu.memory_space<vmem>>, vector<1x1x128xf32>
    tpu.vector_store %arg8[%c0_10, %c0_11, %c0_12], %11 {strides = array<i32>} : memref<1x1x128xf32, #tpu.memory_space<vmem>>, vector<1x1x128xf32>,
    %c0_13 = arith.constant 0 : index
    %c0_14 = arith.constant 0 : index
    %13 = vector.load %arg3[%c0_13, %c0_14] : memref<128x128xbf16, #tpu.memory_space<vmem>>, vector<128x128xbf16>
    %c0_15 = arith.constant 0 : index
    %c0_16 = arith.constant 0 : index
    %14 = vector.load %arg4[%c0_15, %c0_16] : memref<128x128xbf16, #tpu.memory_space<vmem>>, vector<128x128xbf16>
    %cst_17 = arith.constant dense<0.000000e+00> : vector<128x128xf32>
    %15 = tpu.matmul %13, %14, %cst_17 {dimension_numbers = #tpu.dot_dimension_numbers<[1], [0], [0], [1], [0, 0, 1, 1], [], []>} : vector<128x128xbf16>, vector<128x128xbf16>, vector<128x128xf32> -> vector<128x128xf32>
    %c0_18 = arith.constant 0 : index
    %c0_19 = arith.constant 0 : index
    %16 = vector.load %arg6[%c0_18, %c0_19] : memref<128x128xf32, #tpu.memory_space<vmem>>, vector<128x128xf32>
    tpu.vector_store %arg6[%c0_18, %c0_19], %15 {strides = array<i32>} : memref<128x128xf32, #tpu.memory_space<vmem>>, vector<128x128xf32>,
    %cst_20 = arith.constant dense<0.000000e+00> : vector<128xf32>
    %17 = vector.multi_reduction <add>, %15, %cst_20 [0] : vector<128x128xf32> to vector<128xf32>
    %18 = vector.shape_cast %17 : vector<128xf32> to vector<1x128xf32>
    %19 = vector.shape_cast %18 : vector<1x128xf32> to vector<1x1x128xf32>
    %c0_21 = arith.constant 0 : index
    %c0_22 = arith.constant 0 : index
    %c0_23 = arith.constant 0 : index
    %20 = vector.load %arg9[%c0_21, %c0_22, %c0_23] : memref<1x1x128xf32, #tpu.memory_space<vmem>>, vector<1x1x128xf32>
    tpu.vector_store %arg9[%c0_21, %c0_22, %c0_23], %19 {strides = array<i32>} : memref<1x1x128xf32, #tpu.memory_space<vmem>>, vector<1x1x128xf32>,
    %21 = arith.mulf %15, %15 : vector<128x128xf32>
    %cst_24 = arith.constant dense<0.000000e+00> : vector<128xf32>
    %22 = vector.multi_reduction <add>, %21, %cst_24 [0] : vector<128x128xf32> to vector<128xf32>
    %23 = vector.shape_cast %22 : vector<128xf32> to vector<1x128xf32>
    %24 = vector.shape_cast %23 : vector<1x128xf32> to vector<1x1x128xf32>
    %c0_25 = arith.constant 0 : index
    %c0_26 = arith.constant 0 : index
    %c0_27 = arith.constant 0 : index
    %25 = vector.load %arg10[%c0_25, %c0_26, %c0_27] : memref<1x1x128xf32, #tpu.memory_space<vmem>>, vector<1x1x128xf32>
    tpu.vector_store %arg10[%c0_25, %c0_26, %c0_27], %24 {strides = array<i32>} : memref<1x1x128xf32, #tpu.memory_space<vmem>>, vector<1x1x128xf32>,
    return
  }
  func.func @transform_0(%arg0: i32) -> (i32, i32) {
    %c0_i32 = arith.constant 0 : i32
    %c0_i32_0 = arith.constant 0 : i32
    return %arg0, %c0_i32 : i32, i32
  }
  func.func @transform_1(%arg0: i32) -> (i32, i32) {
    %c0_i32 = arith.constant 0 : i32
    %c0_i32_0 = arith.constant 0 : i32
    %c0_i32_1 = arith.constant 0 : i32
    return %c0_i32, %c0_i32_0 : i32, i32
  }
  func.func @transform_2(%arg0: i32) -> (i32, i32) {
    %c0_i32 = arith.constant 0 : i32
    %c0_i32_0 = arith.constant 0 : i32
    return %arg0, %c0_i32 : i32, i32
  }
  func.func @transform_3(%arg0: i32) -> (i32, i32) {
    %c0_i32 = arith.constant 0 : i32
    %c0_i32_0 = arith.constant 0 : i32
    %c0_i32_1 = arith.constant 0 : i32
    return %c0_i32, %c0_i32_0 : i32, i32
  }
  func.func @transform_4(%arg0: i32) -> (i32, i32) {
    %c0_i32 = arith.constant 0 : i32
    %c0_i32_0 = arith.constant 0 : i32
    return %arg0, %c0_i32 : i32, i32
  }
  func.func @transform_5(%arg0: i32) -> (i32, i32) {
    %c0_i32 = arith.constant 0 : i32
    %c0_i32_0 = arith.constant 0 : i32
    return %arg0, %c0_i32 : i32, i32
  }
  func.func @transform_6(%arg0: i32) -> (i32, i32, i32) {
    %c0_i32 = arith.constant 0 : i32
    %c0_i32_0 = arith.constant 0 : i32
    %c0_i32_1 = arith.constant 0 : i32
    return %arg0, %c0_i32, %c0_i32_0 : i32, i32, i32
  }
  func.func @transform_7(%arg0: i32) -> (i32, i32, i32) {
    %c0_i32 = arith.constant 0 : i32
    %c0_i32_0 = arith.constant 0 : i32
    %c0_i32_1 = arith.constant 0 : i32
    return %arg0, %c0_i32, %c0_i32_0 : i32, i32, i32
  }
  func.func @transform_8(%arg0: i32) -> (i32, i32, i32) {
    %c0_i32 = arith.constant 0 : i32
    %c0_i32_0 = arith.constant 0 : i32
    %c0_i32_1 = arith.constant 0 : i32
    return %arg0, %c0_i32, %c0_i32_0 : i32, i32, i32
  }
  func.func @transform_9(%arg0: i32) -> (i32, i32, i32) {
    %c0_i32 = arith.constant 0 : i32
    %c0_i32_0 = arith.constant 0 : i32
    %c0_i32_1 = arith.constant 0 : i32
    return %arg0, %c0_i32, %c0_i32_0 : i32, i32, i32
  }
}

module attributes {stable_mosaic.version = 11 : i64} {
  func.func @bn_add_relu_kernel(%arg0: i32, %arg1: memref<128x128xf32, #tpu.memory_space<vmem>>, %arg2: memref<128x128xf32, #tpu.memory_space<vmem>>, %arg3: memref<1x128xf32, #tpu.memory_space<vmem>>, %arg4: memref<1x128xf32, #tpu.memory_space<vmem>>, %arg5: memref<1x128xf32, #tpu.memory_space<vmem>>, %arg6: memref<1x128xf32, #tpu.memory_space<vmem>>, %arg7: memref<128x128xf32, #tpu.memory_space<vmem>>) attributes {dimension_semantics = [#tpu.dimension_semantics<parallel>], iteration_bounds = array<i64: 1>, scalar_prefetch = 0 : i64, scratch_operands = 0 : i64, tpu.core_type = #tpu.core_type<tc>, window_params = [{transform_indices = @transform_0, window_bounds = array<i64: 128, 128>}, {transform_indices = @transform_1, window_bounds = array<i64: 128, 128>}, {pipeline_mode = #tpu.pipeline_mode<synchronous>, transform_indices = @transform_2, window_bounds = array<i64: 1, 128>}, {pipeline_mode = #tpu.pipeline_mode<synchronous>, transform_indices = @transform_3, window_bounds = array<i64: 1, 128>}, {pipeline_mode = #tpu.pipeline_mode<synchronous>, transform_indices = @transform_4, window_bounds = array<i64: 1, 128>}, {pipeline_mode = #tpu.pipeline_mode<synchronous>, transform_indices = @transform_5, window_bounds = array<i64: 1, 128>}, {transform_indices = @transform_6, window_bounds = array<i64: 128, 128>}]} {
    %c0 = arith.constant 0 : index
    %c0_0 = arith.constant 0 : index
    %0 = vector.load %arg1[%c0, %c0_0] : memref<128x128xf32, #tpu.memory_space<vmem>>, vector<128x128xf32>
    %c0_1 = arith.constant 0 : index
    %c0_2 = arith.constant 0 : index
    %1 = vector.load %arg3[%c0_1, %c0_2] : memref<1x128xf32, #tpu.memory_space<vmem>>, vector<1x128xf32>
    %2 = vector.broadcast %1 : vector<1x128xf32> to vector<128x128xf32>
    %3 = arith.mulf %0, %2 : vector<128x128xf32>
    %c0_3 = arith.constant 0 : index
    %c0_4 = arith.constant 0 : index
    %4 = vector.load %arg4[%c0_3, %c0_4] : memref<1x128xf32, #tpu.memory_space<vmem>>, vector<1x128xf32>
    %5 = vector.broadcast %4 : vector<1x128xf32> to vector<128x128xf32>
    %6 = arith.addf %3, %5 : vector<128x128xf32>
    %c0_5 = arith.constant 0 : index
    %c0_6 = arith.constant 0 : index
    %7 = vector.load %arg2[%c0_5, %c0_6] : memref<128x128xf32, #tpu.memory_space<vmem>>, vector<128x128xf32>
    %c0_7 = arith.constant 0 : index
    %c0_8 = arith.constant 0 : index
    %8 = vector.load %arg5[%c0_7, %c0_8] : memref<1x128xf32, #tpu.memory_space<vmem>>, vector<1x128xf32>
    %9 = vector.broadcast %8 : vector<1x128xf32> to vector<128x128xf32>
    %10 = arith.mulf %7, %9 : vector<128x128xf32>
    %c0_9 = arith.constant 0 : index
    %c0_10 = arith.constant 0 : index
    %11 = vector.load %arg6[%c0_9, %c0_10] : memref<1x128xf32, #tpu.memory_space<vmem>>, vector<1x128xf32>
    %12 = vector.broadcast %11 : vector<1x128xf32> to vector<128x128xf32>
    %13 = arith.addf %10, %12 : vector<128x128xf32>
    %14 = arith.addf %6, %13 : vector<128x128xf32>
    %cst = arith.constant 0.000000e+00 : f32
    %15 = vector.broadcast %cst : f32 to vector<128x128xf32>
    %16 = arith.maximumf %14, %15 : vector<128x128xf32>
    %c0_11 = arith.constant 0 : index
    %c0_12 = arith.constant 0 : index
    %17 = vector.load %arg7[%c0_11, %c0_12] : memref<128x128xf32, #tpu.memory_space<vmem>>, vector<128x128xf32>
    tpu.vector_store %arg7[%c0_11, %c0_12], %16 {strides = array<i32>} : memref<128x128xf32, #tpu.memory_space<vmem>>, vector<128x128xf32>,
    return
  }
  func.func @transform_0(%arg0: i32) -> (i32, i32) {
    %c0_i32 = arith.constant 0 : i32
    %c0_i32_0 = arith.constant 0 : i32
    return %arg0, %c0_i32 : i32, i32
  }
  func.func @transform_1(%arg0: i32) -> (i32, i32) {
    %c0_i32 = arith.constant 0 : i32
    %c0_i32_0 = arith.constant 0 : i32
    return %arg0, %c0_i32 : i32, i32
  }
  func.func @transform_2(%arg0: i32) -> (i32, i32) {
    %c0_i32 = arith.constant 0 : i32
    %c0_i32_0 = arith.constant 0 : i32
    %c0_i32_1 = arith.constant 0 : i32
    return %c0_i32, %c0_i32_0 : i32, i32
  }
  func.func @transform_3(%arg0: i32) -> (i32, i32) {
    %c0_i32 = arith.constant 0 : i32
    %c0_i32_0 = arith.constant 0 : i32
    %c0_i32_1 = arith.constant 0 : i32
    return %c0_i32, %c0_i32_0 : i32, i32
  }
  func.func @transform_4(%arg0: i32) -> (i32, i32) {
    %c0_i32 = arith.constant 0 : i32
    %c0_i32_0 = arith.constant 0 : i32
    %c0_i32_1 = arith.constant 0 : i32
    return %c0_i32, %c0_i32_0 : i32, i32
  }
  func.func @transform_5(%arg0: i32) -> (i32, i32) {
    %c0_i32 = arith.constant 0 : i32
    %c0_i32_0 = arith.constant 0 : i32
    %c0_i32_1 = arith.constant 0 : i32
    return %c0_i32, %c0_i32_0 : i32, i32
  }
  func.func @transform_6(%arg0: i32) -> (i32, i32) {
    %c0_i32 = arith.constant 0 : i32
    %c0_i32_0 = arith.constant 0 : i32
    return %arg0, %c0_i32 : i32, i32
  }
}

</mosaic_0001>

<bundles_post_ra>
// kernel: basic_block_forward.4
= control target key start
LH: loop header
LB: loop body
LE: loop exit
PB: predicated region body
PF: predicated region fallthrough
CT: control target
= control target key end

     0   :  { %s551_s1 = inlined_call_operand.vmem [shape: bf16[128,128], index: 1, kind: input, shape index: {}]   ;;  %s552_s0 = inlined_call_operand.vmem [shape: bf16[128,128], index: 0, kind: input, shape index: {}]   ;;  %s553_s2 = inlined_call_operand.vmem [shape: f32[128,128], index: 2, kind: output, shape index: {0}]   ;;  %s554_s3 = inlined_call_operand.vmem [shape: f32[1,1,128], index: 3, kind: output, shape index: {1}]   ;;  %s555_s4 = inlined_call_operand.vmem [shape: f32[1,1,128], index: 4, kind: output, shape index: {2}]  }
   0x1   :  { %v408_v0 = vld [vmem:[%s551_s1 + $0x38] sm:$0xff]   ;;  %v409_v1 = vld [vmem:[%s551_s1 + $0x30] sm:$0xff]   ;;  %v410_v2 = vld [vmem:[%s551_s1 + $0x28] sm:$0xff]  }
   0x2   :  { %360 = vmatprep.subr.bf16.mxu0 %v408_v0  ;;  %392 = vmatprep.subr.bf16.mxu1 %v408_v0  ;;  %v411_v3 = vld [vmem:[%s551_s1 + $0x20] sm:$0xff]   ;;  %v412_v5 = vld [vmem:[%s551_s1 + $0x18] sm:$0xff]   ;;  %v413_v7 = vld [vmem:[%s551_s1 + $0x10] sm:$0xff]  }
   0x3   :  { %361 = vmatpush3.bf16.msra.mxu0 %v408_v0  ;;  %400 = vmatpush3.bf16.msra.mxu1 %v408_v0  ;;  %v416_v4 = vld [vmem:[%s552_s0] sm:$0xff]   ;;  %v414_v8 = vld [vmem:[%s551_s1 + $0x8] sm:$0xff]   ;;  %v418_v12 = vld [vmem:[%s552_s0 + $0x10] sm:$0xff]  }
   0x4   :  { %362 = vmatprep.subr.bf16.mxu0 %v409_v1  ;;  %393 = vmatprep.subr.bf16.mxu1 %v409_v1  ;;  %v420_v6 = vld [vmem:[%s552_s0 + $0x20] sm:$0xff]   ;;  %v417_v10 = vld [vmem:[%s552_s0 + $0x8] sm:$0xff]   ;;  %v422_v13 = vld [vmem:[%s552_s0 + $0x30] sm:$0xff]  }
   0x5   :  { %376 = vmatprep.mubr.bf16.mxu0 %v416_v4  ;;  %384 = vmatprep.mubr.bf16.mxu1 %v420_v6  ;;  %v415_v9 = vld [vmem:[%s551_s1] sm:$0xff]   ;;  %v421_v11 = vld [vmem:[%s552_s0 + $0x28] sm:$0xff]   ;;  %v419_v14 = vld [vmem:[%s552_s0 + $0x18] sm:$0xff]  }
   0x6   :  { %v423_v15 = vld [vmem:[%s552_s0 + $0x38] sm:$0xff]  }
   0x7   :  { %363 = vmatpush3.bf16.msra.mxu0 %v409_v1  ;;  %401 = vmatpush3.bf16.msra.mxu1 %v409_v1 }
   0x8   :  { %364 = vmatprep.subr.bf16.mxu0 %v410_v2  ;;  %394 = vmatprep.subr.bf16.mxu1 %v410_v2 }
   0xb   :  { %365 = vmatpush3.bf16.msra.mxu0 %v410_v2  ;;  %402 = vmatpush3.bf16.msra.mxu1 %v410_v2 }
   0xc   :  { %366 = vmatprep.subr.bf16.mxu0 %v411_v3  ;;  %395 = vmatprep.subr.bf16.mxu1 %v411_v3 }
   0xf   :  { %367 = vmatpush3.bf16.msra.mxu0 %v411_v3  ;;  %403 = vmatpush3.bf16.msra.mxu1 %v411_v3 }
  0x10   :  { %368 = vmatprep.subr.bf16.mxu0 %v412_v5  ;;  %396 = vmatprep.subr.bf16.mxu1 %v412_v5 }
  0x13   :  { %369 = vmatpush3.bf16.msra.mxu0 %v412_v5  ;;  %404 = vmatpush3.bf16.msra.mxu1 %v412_v5 }
  0x14   :  { %370 = vmatprep.subr.bf16.mxu0 %v413_v7  ;;  %397 = vmatprep.subr.bf16.mxu1 %v413_v7 }
  0x17   :  { %371 = vmatpush3.bf16.msra.mxu0 %v413_v7  ;;  %405 = vmatpush3.bf16.msra.mxu1 %v413_v7 }
  0x18   :  { %372 = vmatprep.subr.bf16.mxu0 %v414_v8  ;;  %398 = vmatprep.subr.bf16.mxu1 %v414_v8 }
  0x1b   :  { %373 = vmatpush3.bf16.msra.mxu0 %v414_v8  ;;  %406 = vmatpush3.bf16.msra.mxu1 %v414_v8 }
  0x1c   :  { %374 = vmatprep.subr.bf16.mxu0 %v415_v9  ;;  %399 = vmatprep.subr.bf16.mxu1 %v415_v9 }
  0x1f   :  { %375 = vmatpush3.bf16.msra.mxu0 %v415_v9  ;;  %407 = vmatpush3.bf16.msra.mxu1 %v415_v9 }
  0x22   :  { %377 = vmatmul.mubr.bf16.vlgmr.msra.gmra.mxu0 %v417_v10  ;;  %385 = vmatmul.mubr.bf16.vlgmr.msra.gmra.mxu1 %v421_v11 }
  0x23   :  { %380 = vmatprep.mubr.bf16.mxu0 %v418_v12  ;;  %388 = vmatprep.mubr.bf16.mxu1 %v422_v13 }
  0x2a   :  { %381 = vmatmul.mubr.bf16.gmra.mxu0 %v419_v14  ;;  %389 = vmatmul.mubr.bf16.gmra.mxu1 %v423_v15 }
  0xe2   :  { %v378_v16 = vpop.f32.mrf.mxu0  ;;  %v386_v17 = vpop.f32.mrf.mxu1 }
  0xe3   :  { %242 = vst [vmem:[%s553_s2 + $0x10] sm:$0xff] %v378_v16  ;;  %250 = vst [vmem:[%s553_s2 + $0x50] sm:$0xff] %v386_v17  ;;  %v280_v29 = vmul.f32 %v378_v16, %v378_v16  ;;  %v288_v59 = vmul.f32 %v386_v17, %v386_v17 }
  0xe4   :  { %v177_v18 = vpop.f32.mrf.mxu0  ;;  %v209_v19 = vpop.f32.mrf.mxu1 }
  0xe5   :  { %240 = vst [vmem:[%s553_s2] sm:$0xff] %v177_v18  ;;  %248 = vst [vmem:[%s553_s2 + $0x40] sm:$0xff] %v209_v19  ;;  %v278_v24 = vmul.f32 %v177_v18, %v177_v18  ;;  %v286_v53 = vmul.f32 %v209_v19, %v209_v19 }
  0xe6   :  { %v379_v20 = vpop.f32.mrf.mxu0  ;;  %v387_v21 = vpop.f32.mrf.mxu1 }
  0xe7   :  { %243 = vst [vmem:[%s553_s2 + $0x18] sm:$0xff] %v379_v20  ;;  %251 = vst [vmem:[%s553_s2 + $0x58] sm:$0xff] %v387_v21  ;;  %v281_v34 = vmul.f32 %v379_v20, %v379_v20  ;;  %v289_v62 = vmul.f32 %v387_v21, %v387_v21 }
  0xe8   :  { %v180_v22 = vpop.f32.mrf.mxu0  ;;  %v212_v23 = vpop.f32.mrf.mxu1 }
  0xe9   :  { %241 = vst [vmem:[%s553_s2 + $0x8] sm:$0xff] %v180_v22  ;;  %v256_v25 = vadd.f32 %v180_v22, %v177_v18  ;;  %v279_v26 = vmul.f32 %v180_v22, %v180_v22  ;;  %249 = vst [vmem:[%s553_s2 + $0x48] sm:$0xff] %v212_v23  ;;  %v287_v57 = vmul.f32 %v212_v23, %v212_v23 }
  0xea   :  { %v382_v27 = vpop.f32.mrf.mxu0  ;;  %v390_v28 = vpop.f32.mrf.mxu1 }
  0xeb   :  { %v257_v30 = vadd.f32 %v378_v16, %v256_v25  ;;  %v294_v31 = vadd.f32 %v279_v26, %v278_v24  ;;  %246 = vst [vmem:[%s553_s2 + $0x30] sm:$0xff] %v382_v27  ;;  %254 = vst [vmem:[%s553_s2 + $0x70] sm:$0xff] %v390_v28  ;;  %v284_v47 = vmul.f32 %v382_v27, %v382_v27 }
  0xec   :  { %v193_v32 = vpop.f32.mrf.mxu0  ;;  %v225_v33 = vpop.f32.mrf.mxu1  ;;  %v292_v7 = vmul.f32 %v390_v28, %v390_v28 }
  0xed   :  { %v295_v35 = vadd.f32 %v294_v31, %v280_v29  ;;  %244 = vst [vmem:[%s553_s2 + $0x20] sm:$0xff] %v193_v32  ;;  %v258_v36 = vadd.f32 %v379_v20, %v257_v30  ;;  %252 = vst [vmem:[%s553_s2 + $0x60] sm:$0xff] %v225_v33  ;;  %v282_v40 = vmul.f32 %v193_v32, %v193_v32 }
  0xee   :  { %v383_v37 = vpop.f32.mrf.mxu0  ;;  %v391_v38 = vpop.f32.mrf.mxu1  ;;  %v290_v2 = vmul.f32 %v225_v33, %v225_v33 }
  0xef   :  { %v259_v39 = vadd.f32 %v258_v36, %v193_v32  ;;  %v296_v41 = vadd.f32 %v295_v35, %v281_v34  ;;  %247 = vst [vmem:[%s553_s2 + $0x38] sm:$0xff] %v383_v37  ;;  %255 = vst [vmem:[%s553_s2 + $0x78] sm:$0xff] %v391_v38  ;;  %v285_v50 = vmul.f32 %v383_v37, %v383_v37 }
  0xf0   :  { %v196_v42 = vpop.f32.mrf.mxu0  ;;  %v228_v43 = vpop.f32.mrf.mxu1  ;;  %v293_v10 = vmul.f32 %v391_v38, %v391_v38 }
  0xf1   :  { %v297_v44 = vadd.f32 %v296_v41, %v282_v40  ;;  %245 = vst [vmem:[%s553_s2 + $0x28] sm:$0xff] %v196_v42  ;;  %v260_v45 = vadd.f32 %v259_v39, %v196_v42  ;;  %v283_v46 = vmul.f32 %v196_v42, %v196_v42  ;;  %253 = vst [vmem:[%s553_s2 + $0x68] sm:$0xff] %v228_v43 }
  0xf2   :  { %v291_v6 = vmul.f32 %v228_v43, %v228_v43 }
  0xf3   :  { %v261_v48 = vadd.f32 %v382_v27, %v260_v45  ;;  %v298_v49 = vadd.f32 %v297_v44, %v283_v46 }
  0xf5   :  { %v262_v51 = vadd.f32 %v383_v37, %v261_v48  ;;  %v299_v52 = vadd.f32 %v298_v49, %v284_v47 }
  0xf7   :  { %v300_v54 = vadd.f32 %v299_v52, %v285_v50  ;;  %v263_v55 = vadd.f32 %v262_v51, %v209_v19 }
  0xf9   :  { %v264_v56 = vadd.f32 %v263_v55, %v212_v23  ;;  %v301_v58 = vadd.f32 %v300_v54, %v286_v53 }
  0xfb   :  { %v265_v60 = vadd.f32 %v386_v17, %v264_v56  ;;  %v302_v61 = vadd.f32 %v301_v58, %v287_v57 }
  0xfd   :  { %v303_v63 = vadd.f32 %v302_v61, %v288_v59  ;;  %v266_v0 = vadd.f32 %v387_v21, %v265_v60 }
  0xff   :  { %v267_v1 = vadd.f32 %v266_v0, %v225_v33  ;;  %v304_v3 = vadd.f32 %v303_v63, %v289_v62 }
 0x101   :  { %v305_v4 = vadd.f32 %v304_v3, %v290_v2  ;;  %v268_v5 = vadd.f32 %v267_v1, %v228_v43 }
 0x103   :  { %v269_v8 = vadd.f32 %v390_v28, %v268_v5  ;;  %v306_v9 = vadd.f32 %v305_v4, %v291_v6 }
 0x105   :  { %v270_v11 = vadd.f32 %v391_v38, %v269_v8  ;;  %v307_v12 = vadd.f32 %v306_v9, %v292_v7 }
 0x107   :  { %v271_v13 = vrot.slane %v270_v11, 4  ;;  %v308_v14 = vadd.f32 %v307_v12, %v293_v10 }
 0x109   :  { %v272_v15 = vadd.f32 %v271_v13, %v270_v11  ;;  %v309_v16 = vrot.slane %v308_v14, 4 }
 0x10b   :  { %v273_v17 = vrot.slane %v272_v15, 2  ;;  %v310_v18 = vadd.f32 %v309_v16, %v308_v14 }
 0x10d   :  { %v274_v19 = vadd.f32 %v273_v17, %v272_v15  ;;  %v311_v20 = vrot.slane %v310_v18, 2 }
 0x10f   :  { %v275_v21 = vrot.slane %v274_v19, 1  ;;  %v312_v22 = vadd.f32 %v311_v20, %v310_v18 }
 0x111   :  { %v276_v23 = vadd.f32 %v275_v21, %v274_v19  ;;  %v313_v24 = vrot.slane %v312_v22, 1 }
 0x113   :  { %277 = vst [vmem:[%s554_s3] sm:$0x1] %v276_v23  ;;  %v314_v25 = vadd.f32 %v313_v24, %v312_v22 }
 0x115   :  { %315 = vst [vmem:[%s555_s4] sm:$0x1] %v314_v25 }

// kernel: basic_block_forward.5
= control target key start
LH: loop header
LB: loop body
LE: loop exit
PB: predicated region body
PF: predicated region fallthrough
CT: control target
= control target key end

     0   :  { %s391_s0 = inlined_call_operand.vmem [shape: f32[128,128], index: 0, kind: input, shape index: {}]   ;;  %s392_s1 = inlined_call_operand.vmem [shape: f32[1,128], index: 1, kind: input, shape index: {}]   ;;  %s393_s2 = inlined_call_operand.vmem [shape: f32[1,128], index: 2, kind: input, shape index: {}]   ;;  %s394_s3 = inlined_call_operand.vmem [shape: bf16[128,128], index: 3, kind: output, shape index: {}]  }
   0x1   :  { %v14_v0 = vld [vmem:[%s391_s0] sm:$0xff]  ;;  %v15_v1 = vld [vmem:[%s391_s0 + $0x8] sm:$0xff]  ;;  %v16_v6 = vld [vmem:[%s391_s0 + $0x10] sm:$0xff] }
   0x2   :  { %v286_v2 = vld [vmem:[%s392_s1] ss:$0 sm:$0xff]  ;;  %v17_v7 = vld [vmem:[%s391_s0 + $0x18] sm:$0xff]  ;;  %v19_v11 = vld [vmem:[%s391_s0 + $0x28] sm:$0xff] }
   0x3   :  { %v37_v3 = vmul.f32 %v286_v2, %v14_v0  ;;  %v38_v4 = vmul.f32 %v286_v2, %v15_v1  ;;  %v293_v5 = vld [vmem:[%s393_s2] ss:$0 sm:$0xff]  ;;  %v39_v8 = vmul.f32 %v286_v2, %v16_v6  ;;  %v40_v9 = vmul.f32 %v286_v2, %v17_v7  ;;  %v20_v12 = vld [vmem:[%s391_s0 + $0x30] sm:$0xff]  ;;  %v21_v17 = vld [vmem:[%s391_s0 + $0x38] sm:$0xff] }
   0x4   :  { %v18_v10 = vld [vmem:[%s391_s0 + $0x20] sm:$0xff]  ;;  %v42_v16 = vmul.f32 %v286_v2, %v19_v11  ;;  %v43_v20 = vmul.f32 %v286_v2, %v20_v12  ;;  %v44_v21 = vmul.f32 %v286_v2, %v21_v17  ;;  %v23_v27 = vld [vmem:[%s391_s0 + $0x48] sm:$0xff]  ;;  %v24_v32 = vld [vmem:[%s391_s0 + $0x50] sm:$0xff] }
   0x5   :  { %v60_v13 = vadd.f32 %v293_v5, %v37_v3  ;;  %v61_v14 = vadd.f32 %v293_v5, %v38_v4  ;;  %v41_v15 = vmul.f32 %v286_v2, %v18_v10  ;;  %v62_v18 = vadd.f32 %v293_v5, %v39_v8  ;;  %v22_v22 = vld [vmem:[%s391_s0 + $0x40] sm:$0xff]  ;;  %v25_v33 = vld [vmem:[%s391_s0 + $0x58] sm:$0xff]  ;;  %v27_v39 = vld [vmem:[%s391_s0 + $0x68] sm:$0xff] }
   0x6   :  { %v63_v19 = vadd.f32 %v293_v5, %v40_v9  ;;  %v65_v26 = vadd.f32 %v293_v5, %v42_v16  ;;  %v66_v30 = vadd.f32 %v293_v5, %v43_v20  ;;  %v67_v31 = vadd.f32 %v293_v5, %v44_v21  ;;  %v26_v38 = vld [vmem:[%s391_s0 + $0x60] sm:$0xff]  ;;  %v28_v44 = vld [vmem:[%s391_s0 + $0x70] sm:$0xff]  ;;  %v29_v49 = vld [vmem:[%s391_s0 + $0x78] sm:$0xff] }
   0x7   :  { %v76_v23 = vmax.f32 %v60_v13, 0.0  ;;  %v77_v24 = vmax.f32 %v61_v14, 0.0  ;;  %v64_v25 = vadd.f32 %v293_v5, %v41_v15  ;;  %v78_v28 = vmax.f32 %v62_v18, 0.0 }
   0x8   :  { %v79_v29 = vmax.f32 %v63_v19, 0.0  ;;  %v81_v36 = vmax.f32 %v65_v26, 0.0  ;;  %v45_v37 = vmul.f32 %v286_v2, %v22_v22  ;;  %v82_v41 = vmax.f32 %v66_v30, 0.0 }
   0x9   :  { %v213_v34 = vpack.c.bf16 %v77_v24, %v76_v23  ;;  %v80_v35 = vmax.f32 %v64_v25, 0.0  ;;  %v83_v42 = vmax.f32 %v67_v31, 0.0  ;;  %v46_v43 = vmul.f32 %v286_v2, %v23_v27 }
   0xa   :  { %v218_v40 = vpack.c.bf16 %v79_v29, %v78_v28  ;;  %v68_v46 = vadd.f32 %v293_v5, %v45_v37  ;;  %v47_v47 = vmul.f32 %v286_v2, %v24_v32  ;;  %v48_v48 = vmul.f32 %v286_v2, %v25_v33 }
   0xb   :  { %214 = vst [vmem:[%s394_s3] sm:$0xff] %v213_v34   ;;  %v223_v45 = vpack.c.bf16 %v81_v36, %v80_v35  ;;  %v228_v50 = vpack.c.bf16 %v83_v42, %v82_v41  ;;  %v69_v51 = vadd.f32 %v293_v5, %v46_v43  ;;  %v49_v52 = vmul.f32 %v286_v2, %v26_v38 }
   0xc   :  { %250 = vst [vmem:[%s394_s3 + $0x8] sm:$0xff] %v218_v40   ;;  %v50_v53 = vmul.f32 %v286_v2, %v27_v39  ;;  %v84_v54 = vmax.f32 %v68_v46, 0.0  ;;  %v70_v55 = vadd.f32 %v293_v5, %v47_v47  ;;  %v71_v56 = vadd.f32 %v293_v5, %v48_v48 }
   0xd   :  { %251 = vst [vmem:[%s394_s3 + $0x10] sm:$0xff] %v223_v45   ;;  %v51_v57 = vmul.f32 %v286_v2, %v28_v44  ;;  %252 = vst [vmem:[%s394_s3 + $0x18] sm:$0xff] %v228_v50   ;;  %v85_v58 = vmax.f32 %v69_v51, 0.0  ;;  %v72_v59 = vadd.f32 %v293_v5, %v49_v52  ;;  %v52_v61 = vmul.f32 %v286_v2, %v29_v49 }
   0xe   :  { %v73_v60 = vadd.f32 %v293_v5, %v50_v53  ;;  %v86_v62 = vmax.f32 %v70_v55, 0.0  ;;  %v87_v63 = vmax.f32 %v71_v56, 0.0 }
   0xf   :  { %v74_v0 = vadd.f32 %v293_v5, %v51_v57  ;;  %v233_v1 = vpack.c.bf16 %v85_v58, %v84_v54  ;;  %v88_v3 = vmax.f32 %v72_v59, 0.0  ;;  %v75_v6 = vadd.f32 %v293_v5, %v52_v61 }
  0x10   :  { %v89_v4 = vmax.f32 %v73_v60, 0.0  ;;  %v238_v7 = vpack.c.bf16 %v87_v63, %v86_v62 }
  0x11   :  { %v90_v8 = vmax.f32 %v74_v0, 0.0  ;;  %253 = vst [vmem:[%s394_s3 + $0x20] sm:$0xff] %v233_v1   ;;  %v91_v10 = vmax.f32 %v75_v6, 0.0 }
  0x12   :  { %v243_v9 = vpack.c.bf16 %v89_v4, %v88_v3  ;;  %254 = vst [vmem:[%s394_s3 + $0x28] sm:$0xff] %v238_v7  }
  0x13   :  { %v248_v2 = vpack.c.bf16 %v91_v10, %v90_v8 }
  0x14   :  { %255 = vst [vmem:[%s394_s3 + $0x30] sm:$0xff] %v243_v9  }
  0x15   :  { %256 = vst [vmem:[%s394_s3 + $0x38] sm:$0xff] %v248_v2  }

// kernel: basic_block_forward.7
= control target key start
LH: loop header
LB: loop body
LE: loop exit
PB: predicated region body
PF: predicated region fallthrough
CT: control target
= control target key end

     0   :  { %s466_s0 = inlined_call_operand.vmem [shape: f32[128,128], index: 0, kind: input, shape index: {}]   ;;  %s467_s1 = inlined_call_operand.vmem [shape: f32[128,128], index: 1, kind: input, shape index: {}]   ;;  %s468_s2 = inlined_call_operand.vmem [shape: f32[1,128], index: 2, kind: input, shape index: {}]   ;;  %s469_s3 = inlined_call_operand.vmem [shape: f32[1,128], index: 3, kind: input, shape index: {}]   ;;  %s470_s4 = inlined_call_operand.vmem [shape: f32[1,128], index: 4, kind: input, shape index: {}]   ;;  %s471_s5 = inlined_call_operand.vmem [shape: f32[1,128], index: 5, kind: input, shape index: {}]   ;;  %s472_s6 = inlined_call_operand.vmem [shape: f32[128,128], index: 6, kind: output, shape index: {}]  }
   0x1   :  { %v23_v0 = vld [vmem:[%s466_s0] sm:$0xff]  ;;  %v24_v8 = vld [vmem:[%s466_s0 + $0x8] sm:$0xff]  ;;  %v25_v10 = vld [vmem:[%s466_s0 + $0x10] sm:$0xff] }
   0x2   :  { %v244_v1 = vld [vmem:[%s468_s2] ss:$0 sm:$0xff]  ;;  %v86_v9 = vld [vmem:[%s467_s1 + $0x8] sm:$0xff]  ;;  %v87_v15 = vld [vmem:[%s467_s1 + $0x10] sm:$0xff] }
   0x3   :  { %v249_v2 = vld [vmem:[%s469_s3] ss:$0 sm:$0xff]  ;;  %v46_v3 = vmul.f32 %v244_v1, %v23_v0  ;;  %v47_v12 = vmul.f32 %v244_v1, %v24_v8  ;;  %v48_v14 = vmul.f32 %v244_v1, %v25_v10  ;;  %v26_v16 = vld [vmem:[%s466_s0 + $0x18] sm:$0xff]  ;;  %v28_v24 = vld [vmem:[%s466_s0 + $0x28] sm:$0xff] }
   0x4   :  { %v85_v4 = vld [vmem:[%s467_s1] sm:$0xff]  ;;  %v88_v17 = vld [vmem:[%s467_s1 + $0x18] sm:$0xff]  ;;  %v49_v20 = vmul.f32 %v244_v1, %v26_v16  ;;  %v90_v29 = vld [vmem:[%s467_s1 + $0x28] sm:$0xff]  ;;  %v51_v38 = vmul.f32 %v244_v1, %v28_v24 }
   0x5   :  { %v258_v5 = vld [vmem:[%s470_s4] ss:$0 sm:$0xff]  ;;  %v69_v11 = vadd.f32 %v249_v2, %v46_v3  ;;  %v70_v25 = vadd.f32 %v249_v2, %v47_v12  ;;  %v71_v27 = vadd.f32 %v249_v2, %v48_v14  ;;  %v29_v34 = vld [vmem:[%s466_s0 + $0x30] sm:$0xff]  ;;  %v30_v44 = vld [vmem:[%s466_s0 + $0x38] sm:$0xff] }
   0x6   :  { %v263_v6 = vld [vmem:[%s471_s5] ss:$0 sm:$0xff]  ;;  %v108_v7 = vmul.f32 %v258_v5, %v85_v4  ;;  %v109_v13 = vmul.f32 %v258_v5, %v86_v9  ;;  %v110_v19 = vmul.f32 %v258_v5, %v87_v15  ;;  %v111_v21 = vmul.f32 %v258_v5, %v88_v17  ;;  %v91_v39 = vld [vmem:[%s467_s1 + $0x30] sm:$0xff]  ;;  %v92_v45 = vld [vmem:[%s467_s1 + $0x38] sm:$0xff] }
   0x7   :  { %v27_v22 = vld [vmem:[%s466_s0 + $0x20] sm:$0xff]  ;;  %v72_v32 = vadd.f32 %v249_v2, %v49_v20  ;;  %v113_v43 = vmul.f32 %v258_v5, %v90_v29  ;;  %v74_v48 = vadd.f32 %v249_v2, %v51_v38  ;;  %v52_v49 = vmul.f32 %v244_v1, %v29_v34  ;;  %v32_v56 = vld [vmem:[%s466_s0 + $0x48] sm:$0xff]  ;;  %v33_v4 = vld [vmem:[%s466_s0 + $0x50] sm:$0xff] }
   0x8   :  { %v131_v18 = vadd.f32 %v263_v6, %v108_v7  ;;  %v89_v23 = vld [vmem:[%s467_s1 + $0x20] sm:$0xff]  ;;  %v132_v26 = vadd.f32 %v263_v6, %v109_v13  ;;  %v50_v28 = vmul.f32 %v244_v1, %v27_v22  ;;  %v133_v31 = vadd.f32 %v263_v6, %v110_v19  ;;  %v94_v3 = vld [vmem:[%s467_s1 + $0x48] sm:$0xff]  ;;  %v34_v12 = vld [vmem:[%s466_s0 + $0x58] sm:$0xff] }
   0x9   :  { %v134_v33 = vadd.f32 %v263_v6, %v111_v21  ;;  %v112_v37 = vmul.f32 %v258_v5, %v89_v23  ;;  %v31_v50 = vld [vmem:[%s466_s0 + $0x40] sm:$0xff]  ;;  %v136_v54 = vadd.f32 %v263_v6, %v113_v43  ;;  %v114_v55 = vmul.f32 %v258_v5, %v91_v39  ;;  %v96_v17 = vld [vmem:[%s467_s1 + $0x58] sm:$0xff]  ;;  %v37_v34 = vld [vmem:[%s466_s0 + $0x70] sm:$0xff] }
   0xa   :  { %v147_v30 = vadd.f32 %v131_v18, %v69_v11  ;;  %v148_v35 = vadd.f32 %v132_v26, %v70_v25  ;;  %v73_v36 = vadd.f32 %v249_v2, %v50_v28  ;;  %v149_v41 = vadd.f32 %v133_v31, %v71_v27  ;;  %v93_v51 = vld [vmem:[%s467_s1 + $0x40] sm:$0xff]  ;;  %v95_v11 = vld [vmem:[%s467_s1 + $0x50] sm:$0xff]  ;;  %v36_v28 = vld [vmem:[%s466_s0 + $0x68] sm:$0xff] }
   0xb   :  { %v150_v42 = vadd.f32 %v134_v33, %v72_v32  ;;  %v135_v47 = vadd.f32 %v263_v6, %v112_v37  ;;  %v75_v58 = vadd.f32 %v249_v2, %v52_v49  ;;  %v53_v59 = vmul.f32 %v244_v1, %v30_v44  ;;  %v35_v22 = vld [vmem:[%s466_s0 + $0x60] sm:$0xff]  ;;  %v98_v33 = vld [vmem:[%s467_s1 + $0x68] sm:$0xff]  ;;  %v99_v43 = vld [vmem:[%s467_s1 + $0x70] sm:$0xff] }
   0xc   :  { %v163_v40 = vmax.f32 %v147_v30, 0.0  ;;  %v164_v46 = vmax.f32 %v148_v35, 0.0  ;;  %v165_v52 = vmax.f32 %v149_v41, 0.0  ;;  %v115_v60 = vmul.f32 %v258_v5, %v92_v45  ;;  %v97_v27 = vld [vmem:[%s467_s1 + $0x60] sm:$0xff]  ;;  %v100_v49 = vld [vmem:[%s467_s1 + $0x78] sm:$0xff] }
   0xd   :  { %v166_v53 = vmax.f32 %v150_v42, 0.0  ;;  %v151_v57 = vadd.f32 %v135_v47, %v73_v36  ;;  %v152_v61 = vadd.f32 %v136_v54, %v74_v48  ;;  %v137_v62 = vadd.f32 %v263_v6, %v114_v55  ;;  %v38_v48 = vld [vmem:[%s466_s0 + $0x78] sm:$0xff] }
   0xe   :  { %179 = vst [vmem:[%s472_s6] sm:$0xff] %v163_v40  ;;  %180 = vst [vmem:[%s472_s6 + $0x8] sm:$0xff] %v164_v46  ;;  %v54_v63 = vmul.f32 %v244_v1, %v31_v50  ;;  %v116_v0 = vmul.f32 %v258_v5, %v93_v51  ;;  %v76_v8 = vadd.f32 %v249_v2, %v53_v59 }
   0xf   :  { %181 = vst [vmem:[%s472_s6 + $0x10] sm:$0xff] %v165_v52  ;;  %182 = vst [vmem:[%s472_s6 + $0x18] sm:$0xff] %v166_v53  ;;  %v167_v7 = vmax.f32 %v151_v57, 0.0  ;;  %v138_v9 = vadd.f32 %v263_v6, %v115_v60  ;;  %v55_v10 = vmul.f32 %v244_v1, %v32_v56  ;;  %v168_v13 = vmax.f32 %v152_v61, 0.0 }
  0x10   :  { %v153_v14 = vadd.f32 %v137_v62, %v75_v58  ;;  %v77_v15 = vadd.f32 %v249_v2, %v54_v63  ;;  %v139_v16 = vadd.f32 %v263_v6, %v116_v0  ;;  %v117_v20 = vmul.f32 %v258_v5, %v94_v3 }
  0x11   :  { %183 = vst [vmem:[%s472_s6 + $0x20] sm:$0xff] %v167_v7  ;;  %v154_v18 = vadd.f32 %v138_v9, %v76_v8  ;;  %v78_v19 = vadd.f32 %v249_v2, %v55_v10  ;;  %v56_v21 = vmul.f32 %v244_v1, %v33_v4  ;;  %184 = vst [vmem:[%s472_s6 + $0x28] sm:$0xff] %v168_v13 }
  0x12   :  { %v169_v23 = vmax.f32 %v153_v14, 0.0  ;;  %v155_v24 = vadd.f32 %v139_v16, %v77_v15  ;;  %v118_v25 = vmul.f32 %v258_v5, %v95_v11  ;;  %v57_v26 = vmul.f32 %v244_v1, %v34_v12 }
  0x13   :  { %v170_v29 = vmax.f32 %v154_v18, 0.0  ;;  %v140_v30 = vadd.f32 %v263_v6, %v117_v20  ;;  %v79_v31 = vadd.f32 %v249_v2, %v56_v21  ;;  %v119_v32 = vmul.f32 %v258_v5, %v96_v17 }
  0x14   :  { %185 = vst [vmem:[%s472_s6 + $0x30] sm:$0xff] %v169_v23  ;;  %v171_v35 = vmax.f32 %v155_v24, 0.0  ;;  %v141_v36 = vadd.f32 %v263_v6, %v118_v25  ;;  %v80_v37 = vadd.f32 %v249_v2, %v57_v26  ;;  %v58_v38 = vmul.f32 %v244_v1, %v35_v22 }
  0x15   :  { %186 = vst [vmem:[%s472_s6 + $0x38] sm:$0xff] %v170_v29  ;;  %v156_v39 = vadd.f32 %v140_v30, %v78_v19  ;;  %v142_v40 = vadd.f32 %v263_v6, %v119_v32  ;;  %v120_v41 = vmul.f32 %v258_v5, %v97_v27  ;;  %v59_v42 = vmul.f32 %v244_v1, %v36_v28 }
  0x16   :  { %187 = vst [vmem:[%s472_s6 + $0x40] sm:$0xff] %v171_v35  ;;  %v157_v44 = vadd.f32 %v141_v36, %v79_v31  ;;  %v81_v45 = vadd.f32 %v249_v2, %v58_v38  ;;  %v121_v46 = vmul.f32 %v258_v5, %v98_v33  ;;  %v60_v47 = vmul.f32 %v244_v1, %v37_v34 }
  0x17   :  { %v172_v50 = vmax.f32 %v156_v39, 0.0  ;;  %v158_v51 = vadd.f32 %v142_v40, %v80_v37  ;;  %v143_v52 = vadd.f32 %v263_v6, %v120_v41  ;;  %v82_v53 = vadd.f32 %v249_v2, %v59_v42 }
  0x18   :  { %v173_v54 = vmax.f32 %v157_v44, 0.0  ;;  %v144_v55 = vadd.f32 %v263_v6, %v121_v46  ;;  %v83_v56 = vadd.f32 %v249_v2, %v60_v47  ;;  %v122_v57 = vmul.f32 %v258_v5, %v99_v43 }
  0x19   :  { %188 = vst [vmem:[%s472_s6 + $0x48] sm:$0xff] %v172_v50  ;;  %v174_v58 = vmax.f32 %v158_v51, 0.0  ;;  %v159_v59 = vadd.f32 %v143_v52, %v81_v45  ;;  %v61_v60 = vmul.f32 %v244_v1, %v38_v48  ;;  %v123_v61 = vmul.f32 %v258_v5, %v100_v49 }
  0x1a   :  { %189 = vst [vmem:[%s472_s6 + $0x50] sm:$0xff] %v173_v54  ;;  %v160_v62 = vadd.f32 %v144_v55, %v82_v53  ;;  %v145_v63 = vadd.f32 %v263_v6, %v122_v57 }
  0x1b   :  { %190 = vst [vmem:[%s472_s6 + $0x58] sm:$0xff] %v174_v58  ;;  %v175_v0 = vmax.f32 %v159_v59, 0.0  ;;  %v84_v3 = vadd.f32 %v249_v2, %v61_v60  ;;  %v146_v4 = vadd.f32 %v263_v6, %v123_v61 }
  0x1c   :  { %v176_v7 = vmax.f32 %v160_v62, 0.0  ;;  %v161_v1 = vadd.f32 %v145_v63, %v83_v56 }
  0x1d   :  { %191 = vst [vmem:[%s472_s6 + $0x60] sm:$0xff] %v175_v0  ;;  %v162_v5 = vadd.f32 %v146_v4, %v84_v3 }
  0x1e   :  { %192 = vst [vmem:[%s472_s6 + $0x68] sm:$0xff] %v176_v7  ;;  %v177_v8 = vmax.f32 %v161_v1, 0.0 }
  0x1f   :  { %v178_v9 = vmax.f32 %v162_v5, 0.0 }
  0x20   :  { %193 = vst [vmem:[%s472_s6 + $0x70] sm:$0xff] %v177_v8 }
  0x21   :  { %194 = vst [vmem:[%s472_s6 + $0x78] sm:$0xff] %v178_v9 }

// kernel: basic_block_forward.6
= control target key start
LH: loop header
LB: loop body
LE: loop exit
PB: predicated region body
PF: predicated region fallthrough
CT: control target
= control target key end

     0   :  { %s1064_s1 = inlined_call_operand.vmem [shape: bf16[128,128], index: 1, kind: input, shape index: {}]   ;;  %s1065_s3 = inlined_call_operand.vmem [shape: bf16[128,128], index: 3, kind: input, shape index: {}]   ;;  %s1066_s0 = inlined_call_operand.vmem [shape: bf16[128,128], index: 0, kind: input, shape index: {}]   ;;  %s1067_s2 = inlined_call_operand.vmem [shape: bf16[128,128], index: 2, kind: input, shape index: {}]   ;;  %s1068_s4 = inlined_call_operand.vmem [shape: f32[128,128], index: 4, kind: output, shape index: {0}]   ;;  %s1069_s5 = inlined_call_operand.vmem [shape: f32[128,128], index: 5, kind: output, shape index: {1}]   ;;  %s1070_s6 = inlined_call_operand.vmem [shape: f32[1,1,128], index: 6, kind: output, shape index: {2}]   ;;  %s1071_s8 = inlined_call_operand.vmem [shape: f32[1,1,128], index: 8, kind: output, shape index: {4}]   ;;  %s1072_s7 = inlined_call_operand.vmem [shape: f32[1,1,128], index: 7, kind: output, shape index: {3}]   ;;  %s1073_s9 = inlined_call_operand.vmem [shape: f32[1,1,128], index: 9, kind: output, shape index: {5}]  }
   0x1   :  { %v778_v0 = vld [vmem:[%s1064_s1 + $0x38] sm:$0xff]   ;;  %v780_v2 = vld [vmem:[%s1064_s1 + $0x30] sm:$0xff]   ;;  %v782_v4 = vld [vmem:[%s1064_s1 + $0x28] sm:$0xff]  }
   0x2   :  { %v779_v1 = vld [vmem:[%s1065_s3 + $0x38] sm:$0xff]   ;;  %714 = vmatprep.subr.bf16.mxu0 %v778_v0  ;;  %v781_v3 = vld [vmem:[%s1065_s3 + $0x30] sm:$0xff]   ;;  %v783_v5 = vld [vmem:[%s1065_s3 + $0x28] sm:$0xff]  }
   0x3   :  { %746 = vmatprep.subr.bf16.mxu1 %v779_v1  ;;  %715 = vmatpush3.bf16.msra.mxu0 %v778_v0  ;;  %v784_v6 = vld [vmem:[%s1064_s1 + $0x20] sm:$0xff]   ;;  %v786_v8 = vld [vmem:[%s1064_s1 + $0x18] sm:$0xff]   ;;  %v788_v10 = vld [vmem:[%s1064_s1 + $0x10] sm:$0xff]  }
   0x4   :  { %747 = vmatpush3.bf16.msra.mxu1 %v779_v1  ;;  %716 = vmatprep.subr.bf16.mxu0 %v780_v2  ;;  %v785_v7 = vld [vmem:[%s1065_s3 + $0x20] sm:$0xff]   ;;  %v787_v9 = vld [vmem:[%s1065_s3 + $0x18] sm:$0xff]   ;;  %v789_v11 = vld [vmem:[%s1065_s3 + $0x10] sm:$0xff]  }
   0x5   :  { %748 = vmatprep.subr.bf16.mxu1 %v781_v3  ;;  %v794_v12 = vld [vmem:[%s1066_s0] sm:$0xff]   ;;  %v790_v14 = vld [vmem:[%s1064_s1 + $0x8] sm:$0xff]   ;;  %v798_v20 = vld [vmem:[%s1066_s0 + $0x10] sm:$0xff]  }
   0x6   :  { %v795_v13 = vld [vmem:[%s1067_s2] sm:$0xff]   ;;  %730 = vmatprep.mubr.bf16.mxu0 %v794_v12  ;;  %v791_v15 = vld [vmem:[%s1065_s3 + $0x8] sm:$0xff]   ;;  %v799_v21 = vld [vmem:[%s1067_s2 + $0x10] sm:$0xff]  }
   0x7   :  { %717 = vmatpush3.bf16.msra.mxu0 %v780_v2  ;;  %762 = vmatprep.mubr.bf16.mxu1 %v795_v13  ;;  %v792_v16 = vld [vmem:[%s1064_s1] sm:$0xff]   ;;  %v796_v18 = vld [vmem:[%s1066_s0 + $0x8] sm:$0xff]   ;;  %v800_v22 = vld [vmem:[%s1066_s0 + $0x18] sm:$0xff]  }
   0x8   :  { %749 = vmatpush3.bf16.msra.mxu1 %v781_v3  ;;  %718 = vmatprep.subr.bf16.mxu0 %v782_v4  ;;  %v793_v17 = vld [vmem:[%s1065_s3] sm:$0xff]   ;;  %v797_v19 = vld [vmem:[%s1067_s2 + $0x8] sm:$0xff]   ;;  %v801_v23 = vld [vmem:[%s1067_s2 + $0x18] sm:$0xff]  }
   0x9   :  { %750 = vmatprep.subr.bf16.mxu1 %v783_v5  ;;  %v802_v24 = vld [vmem:[%s1066_s0 + $0x20] sm:$0xff]   ;;  %v804_v26 = vld [vmem:[%s1066_s0 + $0x28] sm:$0xff]   ;;  %v806_v28 = vld [vmem:[%s1066_s0 + $0x30] sm:$0xff]  }
   0xa   :  { %v803_v25 = vld [vmem:[%s1067_s2 + $0x20] sm:$0xff]   ;;  %v805_v27 = vld [vmem:[%s1067_s2 + $0x28] sm:$0xff]   ;;  %v807_v29 = vld [vmem:[%s1067_s2 + $0x30] sm:$0xff]  }
   0xb   :  { %719 = vmatpush3.bf16.msra.mxu0 %v782_v4  ;;  %v808_v30 = vld [vmem:[%s1066_s0 + $0x38] sm:$0xff]  }
   0xc   :  { %751 = vmatpush3.bf16.msra.mxu1 %v783_v5  ;;  %720 = vmatprep.subr.bf16.mxu0 %v784_v6  ;;  %v809_v31 = vld [vmem:[%s1067_s2 + $0x38] sm:$0xff]  }
   0xd   :  { %752 = vmatprep.subr.bf16.mxu1 %v785_v7 }
   0xf   :  { %721 = vmatpush3.bf16.msra.mxu0 %v784_v6 }
  0x10   :  { %753 = vmatpush3.bf16.msra.mxu1 %v785_v7  ;;  %722 = vmatprep.subr.bf16.mxu0 %v786_v8 }
  0x11   :  { %754 = vmatprep.subr.bf16.mxu1 %v787_v9 }
  0x13   :  { %723 = vmatpush3.bf16.msra.mxu0 %v786_v8 }
  0x14   :  { %755 = vmatpush3.bf16.msra.mxu1 %v787_v9  ;;  %724 = vmatprep.subr.bf16.mxu0 %v788_v10 }
  0x15   :  { %756 = vmatprep.subr.bf16.mxu1 %v789_v11 }
  0x17   :  { %725 = vmatpush3.bf16.msra.mxu0 %v788_v10 }
  0x18   :  { %757 = vmatpush3.bf16.msra.mxu1 %v789_v11  ;;  %726 = vmatprep.subr.bf16.mxu0 %v790_v14 }
  0x19   :  { %758 = vmatprep.subr.bf16.mxu1 %v791_v15 }
  0x1b   :  { %727 = vmatpush3.bf16.msra.mxu0 %v790_v14 }
  0x1c   :  { %759 = vmatpush3.bf16.msra.mxu1 %v791_v15  ;;  %728 = vmatprep.subr.bf16.mxu0 %v792_v16 }
  0x1d   :  { %760 = vmatprep.subr.bf16.mxu1 %v793_v17 }
  0x1f   :  { %729 = vmatpush3.bf16.msra.mxu0 %v792_v16 }
  0x20   :  { %761 = vmatpush3.bf16.msra.mxu1 %v793_v17 }
  0x22   :  { %731 = vmatmul.mubr.bf16.vlgmr.msra.gmra.mxu0 %v796_v18 }
  0x23   :  { %763 = vmatmul.mubr.bf16.vlgmr.msra.gmra.mxu1 %v797_v19  ;;  %734 = vmatprep.mubr.bf16.mxu0 %v798_v20 }
  0x24   :  { %766 = vmatprep.mubr.bf16.mxu1 %v799_v21 }
  0x2a   :  { %735 = vmatmul.mubr.bf16.gmra.mxu0 %v800_v22 }
  0x2b   :  { %767 = vmatmul.mubr.bf16.gmra.mxu1 %v801_v23  ;;  %738 = vmatprep.mubr.bf16.mxu0 %v802_v24 }
  0x2c   :  { %770 = vmatprep.mubr.bf16.mxu1 %v803_v25 }
  0x32   :  { %739 = vmatmul.mubr.bf16.gmra.mxu0 %v804_v26 }
  0x33   :  { %771 = vmatmul.mubr.bf16.gmra.mxu1 %v805_v27  ;;  %742 = vmatprep.mubr.bf16.mxu0 %v806_v28 }
  0x34   :  { %774 = vmatprep.mubr.bf16.mxu1 %v807_v29 }
  0x3a   :  { %743 = vmatmul.mubr.bf16.gmra.mxu0 %v808_v30 }
  0x3b   :  { %775 = vmatmul.mubr.bf16.gmra.mxu1 %v809_v31 }
  0xe2   :  { %v732_v32 = vpop.f32.mrf.mxu0 }
  0xe3   :  { %251 = vst [vmem:[%s1068_s4 + $0x10] sm:$0xff] %v732_v32  ;;  %v764_v33 = vpop.f32.mrf.mxu1  ;;  %v289_v47 = vmul.f32 %v732_v32, %v732_v32 }
  0xe4   :  { %552 = vst [vmem:[%s1069_s5 + $0x10] sm:$0xff] %v764_v33  ;;  %v186_v34 = vpop.f32.mrf.mxu0  ;;  %v590_v51 = vmul.f32 %v764_v33, %v764_v33 }
  0xe5   :  { %249 = vst [vmem:[%s1068_s4] sm:$0xff] %v186_v34  ;;  %v487_v35 = vpop.f32.mrf.mxu1  ;;  %v287_v39 = vmul.f32 %v186_v34, %v186_v34 }
  0xe6   :  { %550 = vst [vmem:[%s1069_s5] sm:$0xff] %v487_v35  ;;  %v733_v36 = vpop.f32.mrf.mxu0  ;;  %v588_v43 = vmul.f32 %v487_v35, %v487_v35 }
  0xe7   :  { %252 = vst [vmem:[%s1068_s4 + $0x18] sm:$0xff] %v733_v36  ;;  %v765_v37 = vpop.f32.mrf.mxu1  ;;  %v290_v55 = vmul.f32 %v733_v36, %v733_v36 }
  0xe8   :  { %553 = vst [vmem:[%s1069_s5 + $0x18] sm:$0xff] %v765_v37  ;;  %v189_v38 = vpop.f32.mrf.mxu0  ;;  %v591_v59 = vmul.f32 %v765_v37, %v765_v37 }
  0xe9   :  { %250 = vst [vmem:[%s1068_s4 + $0x8] sm:$0xff] %v189_v38  ;;  %v265_v40 = vadd.f32 %v189_v38, %v186_v34  ;;  %v288_v41 = vmul.f32 %v189_v38, %v189_v38  ;;  %v490_v42 = vpop.f32.mrf.mxu1 }
  0xea   :  { %551 = vst [vmem:[%s1069_s5 + $0x8] sm:$0xff] %v490_v42  ;;  %v566_v44 = vadd.f32 %v490_v42, %v487_v35  ;;  %v589_v45 = vmul.f32 %v490_v42, %v490_v42  ;;  %v736_v46 = vpop.f32.mrf.mxu0 }
  0xeb   :  { %v266_v48 = vadd.f32 %v732_v32, %v265_v40  ;;  %v303_v49 = vadd.f32 %v288_v41, %v287_v39  ;;  %255 = vst [vmem:[%s1068_s4 + $0x30] sm:$0xff] %v736_v46  ;;  %v768_v50 = vpop.f32.mrf.mxu1  ;;  %v293_v15 = vmul.f32 %v736_v46, %v736_v46 }
  0xec   :  { %v567_v52 = vadd.f32 %v764_v33, %v566_v44  ;;  %v604_v53 = vadd.f32 %v589_v45, %v588_v43  ;;  %556 = vst [vmem:[%s1069_s5 + $0x30] sm:$0xff] %v768_v50  ;;  %v202_v54 = vpop.f32.mrf.mxu0  ;;  %v594_v19 = vmul.f32 %v768_v50, %v768_v50 }
  0xed   :  { %v304_v56 = vadd.f32 %v303_v49, %v289_v47  ;;  %253 = vst [vmem:[%s1068_s4 + $0x20] sm:$0xff] %v202_v54  ;;  %v267_v57 = vadd.f32 %v733_v36, %v266_v48  ;;  %v503_v58 = vpop.f32.mrf.mxu1  ;;  %v291_v0 = vmul.f32 %v202_v54, %v202_v54 }
  0xee   :  { %v605_v60 = vadd.f32 %v604_v53, %v590_v51  ;;  %554 = vst [vmem:[%s1069_s5 + $0x20] sm:$0xff] %v503_v58  ;;  %v568_v61 = vadd.f32 %v765_v37, %v567_v52  ;;  %v737_v62 = vpop.f32.mrf.mxu0  ;;  %v592_v4 = vmul.f32 %v503_v58, %v503_v58 }
  0xef   :  { %v268_v63 = vadd.f32 %v267_v57, %v202_v54  ;;  %v305_v1 = vadd.f32 %v304_v56, %v290_v55  ;;  %256 = vst [vmem:[%s1068_s4 + $0x38] sm:$0xff] %v737_v62  ;;  %v769_v2 = vpop.f32.mrf.mxu1  ;;  %v294_v23 = vmul.f32 %v737_v62, %v737_v62 }
  0xf0   :  { %v569_v3 = vadd.f32 %v568_v61, %v503_v58  ;;  %v606_v5 = vadd.f32 %v605_v60, %v591_v59  ;;  %557 = vst [vmem:[%s1069_s5 + $0x38] sm:$0xff] %v769_v2  ;;  %v205_v6 = vpop.f32.mrf.mxu0  ;;  %v595_v27 = vmul.f32 %v769_v2, %v769_v2 }
  0xf1   :  { %v306_v7 = vadd.f32 %v305_v1, %v291_v0  ;;  %254 = vst [vmem:[%s1068_s4 + $0x28] sm:$0xff] %v205_v6  ;;  %v269_v8 = vadd.f32 %v268_v63, %v205_v6  ;;  %v292_v9 = vmul.f32 %v205_v6, %v205_v6  ;;  %v506_v10 = vpop.f32.mrf.mxu1 }
  0xf2   :  { %v607_v11 = vadd.f32 %v606_v5, %v592_v4  ;;  %555 = vst [vmem:[%s1069_s5 + $0x28] sm:$0xff] %v506_v10  ;;  %v570_v12 = vadd.f32 %v569_v3, %v506_v10  ;;  %v593_v13 = vmul.f32 %v506_v10, %v506_v10  ;;  %v740_v14 = vpop.f32.mrf.mxu0 }
  0xf3   :  { %v270_v16 = vadd.f32 %v736_v46, %v269_v8  ;;  %v307_v17 = vadd.f32 %v306_v7, %v292_v9  ;;  %259 = vst [vmem:[%s1068_s4 + $0x50] sm:$0xff] %v740_v14  ;;  %v772_v18 = vpop.f32.mrf.mxu1  ;;  %v297_v47 = vmul.f32 %v740_v14, %v740_v14 }
  0xf4   :  { %v571_v20 = vadd.f32 %v768_v50, %v570_v12  ;;  %v608_v21 = vadd.f32 %v607_v11, %v593_v13  ;;  %560 = vst [vmem:[%s1069_s5 + $0x50] sm:$0xff] %v772_v18  ;;  %v218_v22 = vpop.f32.mrf.mxu0  ;;  %v598_v51 = vmul.f32 %v772_v18, %v772_v18 }
  0xf5   :  { %v308_v24 = vadd.f32 %v307_v17, %v293_v15  ;;  %257 = vst [vmem:[%s1068_s4 + $0x40] sm:$0xff] %v218_v22  ;;  %v271_v25 = vadd.f32 %v737_v62, %v270_v16  ;;  %v519_v26 = vpop.f32.mrf.mxu1  ;;  %v295_v32 = vmul.f32 %v218_v22, %v218_v22 }
  0xf6   :  { %v609_v28 = vadd.f32 %v608_v21, %v594_v19  ;;  %558 = vst [vmem:[%s1069_s5 + $0x40] sm:$0xff] %v519_v26  ;;  %v572_v29 = vadd.f32 %v769_v2, %v571_v20  ;;  %v741_v30 = vpop.f32.mrf.mxu0  ;;  %v596_v36 = vmul.f32 %v519_v26, %v519_v26 }
  0xf7   :  { %v272_v31 = vadd.f32 %v271_v25, %v218_v22  ;;  %v309_v33 = vadd.f32 %v308_v24, %v294_v23  ;;  %260 = vst [vmem:[%s1068_s4 + $0x58] sm:$0xff] %v741_v30  ;;  %v773_v34 = vpop.f32.mrf.mxu1  ;;  %v298_v55 = vmul.f32 %v741_v30, %v741_v30 }
  0xf8   :  { %v573_v35 = vadd.f32 %v572_v29, %v519_v26  ;;  %v610_v37 = vadd.f32 %v609_v28, %v595_v27  ;;  %561 = vst [vmem:[%s1069_s5 + $0x58] sm:$0xff] %v773_v34  ;;  %v221_v38 = vpop.f32.mrf.mxu0  ;;  %v599_v59 = vmul.f32 %v773_v34, %v773_v34 }
  0xf9   :  { %v310_v39 = vadd.f32 %v309_v33, %v295_v32  ;;  %258 = vst [vmem:[%s1068_s4 + $0x48] sm:$0xff] %v221_v38  ;;  %v273_v40 = vadd.f32 %v272_v31, %v221_v38  ;;  %v296_v41 = vmul.f32 %v221_v38, %v221_v38  ;;  %v522_v42 = vpop.f32.mrf.mxu1 }
  0xfa   :  { %v611_v43 = vadd.f32 %v610_v37, %v596_v36  ;;  %559 = vst [vmem:[%s1069_s5 + $0x48] sm:$0xff] %v522_v42  ;;  %v574_v44 = vadd.f32 %v573_v35, %v522_v42  ;;  %v597_v45 = vmul.f32 %v522_v42, %v522_v42  ;;  %v744_v46 = vpop.f32.mrf.mxu0 }
  0xfb   :  { %v274_v48 = vadd.f32 %v740_v14, %v273_v40  ;;  %v311_v49 = vadd.f32 %v310_v39, %v296_v41  ;;  %263 = vst [vmem:[%s1068_s4 + $0x70] sm:$0xff] %v744_v46  ;;  %v776_v50 = vpop.f32.mrf.mxu1  ;;  %v301_v14 = vmul.f32 %v744_v46, %v744_v46 }
  0xfc   :  { %v575_v52 = vadd.f32 %v772_v18, %v574_v44  ;;  %v612_v53 = vadd.f32 %v611_v43, %v597_v45  ;;  %564 = vst [vmem:[%s1069_s5 + $0x70] sm:$0xff] %v776_v50  ;;  %v234_v54 = vpop.f32.mrf.mxu0  ;;  %v602_v17 = vmul.f32 %v776_v50, %v776_v50 }
  0xfd   :  { %v312_v56 = vadd.f32 %v311_v49, %v297_v47  ;;  %261 = vst [vmem:[%s1068_s4 + $0x60] sm:$0xff] %v234_v54  ;;  %v275_v57 = vadd.f32 %v741_v30, %v274_v48  ;;  %v535_v58 = vpop.f32.mrf.mxu1  ;;  %v299_v0 = vmul.f32 %v234_v54, %v234_v54 }
  0xfe   :  { %v613_v60 = vadd.f32 %v612_v53, %v598_v51  ;;  %562 = vst [vmem:[%s1069_s5 + $0x60] sm:$0xff] %v535_v58  ;;  %v576_v61 = vadd.f32 %v773_v34, %v575_v52  ;;  %v745_v62 = vpop.f32.mrf.mxu0  ;;  %v600_v4 = vmul.f32 %v535_v58, %v535_v58 }
  0xff   :  { %v276_v63 = vadd.f32 %v275_v57, %v234_v54  ;;  %v313_v1 = vadd.f32 %v312_v56, %v298_v55  ;;  %264 = vst [vmem:[%s1068_s4 + $0x78] sm:$0xff] %v745_v62  ;;  %v777_v2 = vpop.f32.mrf.mxu1  ;;  %v302_v20 = vmul.f32 %v745_v62, %v745_v62 }
 0x100   :  { %v577_v3 = vadd.f32 %v576_v61, %v535_v58  ;;  %v614_v5 = vadd.f32 %v613_v60, %v599_v59  ;;  %565 = vst [vmem:[%s1069_s5 + $0x78] sm:$0xff] %v777_v2  ;;  %v237_v6 = vpop.f32.mrf.mxu0  ;;  %v603_v23 = vmul.f32 %v777_v2, %v777_v2 }
 0x101   :  { %v314_v7 = vadd.f32 %v313_v1, %v299_v0  ;;  %262 = vst [vmem:[%s1068_s4 + $0x68] sm:$0xff] %v237_v6  ;;  %v277_v8 = vadd.f32 %v276_v63, %v237_v6  ;;  %v300_v9 = vmul.f32 %v237_v6, %v237_v6  ;;  %v538_v10 = vpop.f32.mrf.mxu1 }
 0x102   :  { %v615_v11 = vadd.f32 %v614_v5, %v600_v4  ;;  %563 = vst [vmem:[%s1069_s5 + $0x68] sm:$0xff] %v538_v10  ;;  %v578_v12 = vadd.f32 %v577_v3, %v538_v10  ;;  %v601_v13 = vmul.f32 %v538_v10, %v538_v10 }
 0x103   :  { %v278_v15 = vadd.f32 %v744_v46, %v277_v8  ;;  %v315_v16 = vadd.f32 %v314_v7, %v300_v9 }
 0x104   :  { %v579_v18 = vadd.f32 %v776_v50, %v578_v12  ;;  %v616_v19 = vadd.f32 %v615_v11, %v601_v13 }
 0x105   :  { %v279_v21 = vadd.f32 %v745_v62, %v278_v15  ;;  %v316_v22 = vadd.f32 %v315_v16, %v301_v14 }
 0x106   :  { %v580_v24 = vadd.f32 %v777_v2, %v579_v18  ;;  %v617_v25 = vadd.f32 %v616_v19, %v602_v17 }
 0x107   :  { %v280_v26 = vrot.slane %v279_v21, 4  ;;  %v317_v27 = vadd.f32 %v316_v22, %v302_v20 }
 0x108   :  { %v581_v28 = vrot.slane %v580_v24, 4  ;;  %v618_v29 = vadd.f32 %v617_v25, %v603_v23 }
 0x109   :  { %v281_v30 = vadd.f32 %v280_v26, %v279_v21  ;;  %v318_v31 = vrot.slane %v317_v27, 4 }
 0x10a   :  { %v582_v32 = vadd.f32 %v581_v28, %v580_v24  ;;  %v619_v33 = vrot.slane %v618_v29, 4 }
 0x10b   :  { %v282_v34 = vrot.slane %v281_v30, 2  ;;  %v319_v35 = vadd.f32 %v318_v31, %v317_v27 }
 0x10c   :  { %v583_v36 = vrot.slane %v582_v32, 2  ;;  %v620_v37 = vadd.f32 %v619_v33, %v618_v29 }
 0x10d   :  { %v283_v38 = vadd.f32 %v282_v34, %v281_v30  ;;  %v320_v39 = vrot.slane %v319_v35, 2 }
 0x10e   :  { %v584_v40 = vadd.f32 %v583_v36, %v582_v32  ;;  %v621_v41 = vrot.slane %v620_v37, 2 }
 0x10f   :  { %v284_v42 = vrot.slane %v283_v38, 1  ;;  %v321_v43 = vadd.f32 %v320_v39, %v319_v35 }
 0x110   :  { %v585_v44 = vrot.slane %v584_v40, 1  ;;  %v622_v45 = vadd.f32 %v621_v41, %v620_v37 }
 0x111   :  { %v285_v46 = vadd.f32 %v284_v42, %v283_v38  ;;  %v322_v47 = vrot.slane %v321_v43, 1 }
 0x112   :  { %v586_v48 = vadd.f32 %v585_v44, %v584_v40  ;;  %v623_v49 = vrot.slane %v622_v45, 1 }
 0x113   :  { %286 = vst [vmem:[%s1070_s6] sm:$0x1] %v285_v46  ;;  %v323_v50 = vadd.f32 %v322_v47, %v321_v43 }
 0x114   :  { %587 = vst [vmem:[%s1071_s8] sm:$0x1] %v586_v48  ;;  %v624_v51 = vadd.f32 %v623_v49, %v622_v45 }
 0x115   :  { %324 = vst [vmem:[%s1072_s7] sm:$0x1] %v323_v50 }
 0x116   :  { %625 = vst [vmem:[%s1073_s9] sm:$0x1] %v624_v51 }

</bundles_post_ra>
